<compile_context>
chip_gen: v7x
topology: tpu7x:2x2x1
jax: 0.10.0
libtpu: 0.0.40
codegen_flags: <defaults>
</compile_context>

<pallas_src>
import functools

import jax
import jax.numpy as jnp
from jax.experimental import pallas as pl
from jax.experimental.pallas import tpu as pltpu


def _graph_conv_kernel(a_ref, hs_ref, wr_ref, bias_ref, out_ref, acc_ref, *, cin):
    """One (out-tile j, node-tile k) grid step.

    a_ref    : (tkn, N)        adjacency rows for this node tile
    hs_ref   : (Cin, B, N)     channel-major activations, VMEM-resident for whole grid
    wr_ref   : (Cin, tkn, tn)  Linear weight rows for this node tile / output tile
    bias_ref : (1, tn)
    out_ref  : (B, tn)
    acc_ref  : (B, tn) f32     accumulator, lives across the k (reduction) axis
    """
    k = pl.program_id(1)

    @pl.when(k == 0)
    def _init():
        acc_ref[...] = jnp.zeros_like(acc_ref)

    a_k = a_ref[...]                                     # (tkn, N)
    contrib = None
    for c in range(cin):                                 # static unroll, cin is small
        # AH_c = H[:, :, c] @ A_k^T -> (B, tkn); contract over source node m.
        ah_c = jax.lax.dot_general(
            hs_ref[c], a_k,
            dimension_numbers=(((1,), (1,)), ((), ())),
            preferred_element_type=jnp.float32,
        )
        # Weight rows for (node in tile, channel c): (tkn, tn).
        term = jnp.dot(ah_c, wr_ref[c], preferred_element_type=jnp.float32)
        contrib = term if contrib is None else contrib + term
    acc_ref[...] += contrib

    @pl.when(k == pl.num_programs(1) - 1)
    def _finalize():
        y = acc_ref[...] + bias_ref[...]                 # f32 epilogue
        out_ref[...] = jnp.maximum(y, 0.0).astype(out_ref.dtype)


def _pick_tile(dim, target, align):
    """Largest multiple of `align` that divides `dim` and is <= target (else dim)."""
    if dim <= target:
        return dim
    t = (target // align) * align
    while t >= align:
        if dim % t == 0:
            return t
        t -= align
    return dim


@functools.partial(jax.jit, static_argnames=("in_channels",))
def graph_conv_forward(x, adj, weight, bias, *, in_channels):
    """Fused GraphConv forward.
    x: (B, C, H, W) NCHW, adj: (N, N), weight: (N*Cout, N*Cin) (PyTorch Linear
    layout), bias: (N*Cout,).  Returns (B, N*Cout)."""
    batch, chan, hh, ww = x.shape
    num_nodes = (chan * hh * ww) // in_channels
    f_in = num_nodes * in_channels
    f_out = weight.shape[0]
    assert adj.shape == (num_nodes, num_nodes)
    assert weight.shape == (f_out, f_in)

    # torch .view(B, -1, Cin) == row-major reshape of the contiguous NCHW buffer.
    h = x.reshape(batch, num_nodes, in_channels)
    # Channel-major, lane-dense layout for the kernel (tiny tensor).
    hs = jnp.transpose(h, (2, 0, 1))                                    # (Cin, B, N)
    # Fold the (node, channel) flatten order into the weight layout once, outside
    # the kernel:  wr[c, n, :] == weight.T[n*Cin + c, :].   (In a real model this
    # re-layout would be done once at parameter-load time.)
    wr = jnp.transpose(weight.T.reshape(num_nodes, in_channels, f_out), (1, 0, 2))
    bias2 = bias.reshape(1, f_out)

    # Lane-dense output tiles (multiple of 128); node tiles multiple of 8 so the
    # Linear K-chunk (tkn*Cin) stays MXU-friendly (>=256 for typical Cin).
    tn = _pick_tile(f_out, 512, 128)
    tkn = _pick_tile(num_nodes, 128, 8)
    grid = (f_out // tn, num_nodes // tkn)

    kernel = functools.partial(_graph_conv_kernel, cin=in_channels)
    out = pl.pallas_call(
        kernel,
        out_shape=jax.ShapeDtypeStruct((batch, f_out), x.dtype),
        grid_spec=pltpu.PrefetchScalarGridSpec(
            num_scalar_prefetch=0,
            grid=grid,
            in_specs=[
                # Adjacency rows: indexed only by node tile (never by batch).
                pl.BlockSpec((tkn, num_nodes), lambda j, k: (k, 0)),
                # Activations: constant block index -> DMA'd once, VMEM-resident.
                pl.BlockSpec((in_channels, batch, num_nodes), lambda j, k: (0, 0, 0)),
                # Linear weight tile.
                pl.BlockSpec((in_channels, tkn, tn), lambda j, k: (0, k, j)),
                # Bias tile (only changes with j).
                pl.BlockSpec((1, tn), lambda j, k: (0, j)),
            ],
            out_specs=pl.BlockSpec((batch, tn), lambda j, k: (0, j)),
            scratch_shapes=[pltpu.VMEM((batch, tn), jnp.float32)],
        ),
        compiler_params=pltpu.CompilerParams(
            dimension_semantics=("parallel", "arbitrary"),
            # NOTE: tiles here are small (few MiB live); for production-size graphs
            # raise vmem_limit_bytes per generation (keep <= ~48 MiB on v7x's 64 MiB).
        ),
    )(adj, hs, wr, bias2)
    return out


def _reference_forward(x, adj, weight, bias, in_channels):
    """Pure-JAX reference matching the PyTorch module."""
    batch = x.shape[0]
    h = x.reshape(batch, -1, in_channels)
    ah = jnp.einsum("nm,bmc->bnc", adj, h)
    ah_flat = ah.reshape(batch, -1)
    return jnp.maximum(ah_flat @ weight.T + bias, 0.0)


if __name__ == "__main__":
    key = jax.random.PRNGKey(0)
    k1, k2, k3, k4 = jax.random.split(key, 4)

    batch, in_channels, image_size, out_channels = 2, 4, 16, 4
    num_nodes = image_size * image_size            # 256
    f_in = num_nodes * in_channels                 # 1024
    f_out = num_nodes * out_channels               # 1024

    x = jax.random.normal(k1, (batch, in_channels, image_size, image_size), jnp.float32)
    adj = jax.random.normal(k2, (num_nodes, num_nodes), jnp.float32) / (num_nodes ** 0.5)
    weight = jax.random.normal(k3, (f_out, f_in), jnp.float32) / (f_in ** 0.5)
    bias = jax.random.normal(k4, (f_out,), jnp.float32) * 0.1

    out = graph_conv_forward(x, adj, weight, bias, in_channels=in_channels)
    out = jax.block_until_ready(out)
    assert out.shape == (batch, f_out), out.shape

    ref = _reference_forward(x, adj, weight, bias, in_channels)
    rel_err = float(jnp.max(jnp.abs(out - ref)) / (jnp.max(jnp.abs(ref)) + 1e-6))
    assert rel_err < 5e-2, f"kernel/reference mismatch: rel_err={rel_err}"

    print("KERNEL_OK")
</pallas_src>

<mosaic_0001>
module attributes {stable_mosaic.version = 11 : i64} {
  func.func @_graph_conv_kernel(%arg0: i32, %arg1: i32, %arg2: memref<128x256xf32, #tpu.memory_space<vmem>>, %arg3: memref<4x2x256xf32, #tpu.memory_space<vmem>>, %arg4: memref<4x128x512xf32, #tpu.memory_space<vmem>>, %arg5: memref<1x512xf32, #tpu.memory_space<vmem>>, %arg6: memref<2x512xf32, #tpu.memory_space<vmem>>, %arg7: memref<2x512xf32, #tpu.memory_space<vmem>>) attributes {dimension_semantics = [#tpu.dimension_semantics<parallel>, #tpu.dimension_semantics<arbitrary>], iteration_bounds = array<i64: 2, 2>, scalar_prefetch = 0 : i64, scratch_operands = 1 : i64, tpu.core_type = #tpu.core_type<tc>, window_params = [{transform_indices = @transform_0, window_bounds = array<i64: 128, 256>}, {pipeline_mode = #tpu.pipeline_mode<synchronous>, transform_indices = @transform_1, window_bounds = array<i64: 4, 2, 256>}, {transform_indices = @transform_2, window_bounds = array<i64: 4, 128, 512>}, {transform_indices = @transform_3, window_bounds = array<i64: 1, 512>}, {transform_indices = @transform_4, window_bounds = array<i64: 2, 512>}]} {
    %c0_i32 = arith.constant 0 : i32
    %0 = arith.cmpi eq, %arg1, %c0_i32 : i32
    %1 = arith.extui %0 : i1 to i32
    %c0_i32_0 = arith.constant 0 : i32
    %2 = arith.cmpi ne, %1, %c0_i32_0 : i32
    scf.if %2 {
      %cst_35 = arith.constant 0.000000e+00 : f32
      %37 = vector.broadcast %cst_35 : f32 to vector<2x512xf32>
      %c0_36 = arith.constant 0 : index
      %c0_37 = arith.constant 0 : index
      %38 = vector.load %arg7[%c0_36, %c0_37] : memref<2x512xf32, #tpu.memory_space<vmem>>, vector<2x512xf32>
      tpu.vector_store %arg7[%c0_36, %c0_37], %37 {strides = array<i32>} : memref<2x512xf32, #tpu.memory_space<vmem>>, vector<2x512xf32>,
    } else {
    }
    %c0 = arith.constant 0 : index
    %c0_1 = arith.constant 0 : index
    %3 = vector.load %arg2[%c0, %c0_1] : memref<128x256xf32, #tpu.memory_space<vmem>>, vector<128x256xf32>
    %c0_2 = arith.constant 0 : index
    %c0_3 = arith.constant 0 : index
    %c0_4 = arith.constant 0 : index
    %4 = vector.load %arg3[%c0_2, %c0_3, %c0_4] : memref<4x2x256xf32, #tpu.memory_space<vmem>>, vector<1x2x256xf32>
    %5 = vector.shape_cast %4 : vector<1x2x256xf32> to vector<2x256xf32>
    %cst = arith.constant dense<0.000000e+00> : vector<2x128xf32>
    %6 = tpu.matmul %5, %3, %cst {dimension_numbers = #tpu.dot_dimension_numbers<[1], [1], [0], [0], [0, 0, 1, 0], [], []>} : vector<2x256xf32>, vector<128x256xf32>, vector<2x128xf32> -> vector<2x128xf32>
    %c0_5 = arith.constant 0 : index
    %c0_6 = arith.constant 0 : index
    %c0_7 = arith.constant 0 : index
    %7 = vector.load %arg4[%c0_5, %c0_6, %c0_7] : memref<4x128x512xf32, #tpu.memory_space<vmem>>, vector<1x128x512xf32>
    %8 = vector.shape_cast %7 : vector<1x128x512xf32> to vector<128x512xf32>
    %cst_8 = arith.constant dense<0.000000e+00> : vector<2x512xf32>
    %9 = tpu.matmul %6, %8, %cst_8 {dimension_numbers = #tpu.dot_dimension_numbers<[1], [0], [0], [1], [0, 0, 1, 1], [], []>} : vector<2x128xf32>, vector<128x512xf32>, vector<2x512xf32> -> vector<2x512xf32>
    %c1 = arith.constant 1 : index
    %c0_9 = arith.constant 0 : index
    %c0_10 = arith.constant 0 : index
    %10 = vector.load %arg3[%c1, %c0_9, %c0_10] : memref<4x2x256xf32, #tpu.memory_space<vmem>>, vector<1x2x256xf32>
    %11 = vector.shape_cast %10 : vector<1x2x256xf32> to vector<2x256xf32>
    %cst_11 = arith.constant dense<0.000000e+00> : vector<2x128xf32>
    %12 = tpu.matmul %11, %3, %cst_11 {dimension_numbers = #tpu.dot_dimension_numbers<[1], [1], [0], [0], [0, 0, 1, 0], [], []>} : vector<2x256xf32>, vector<128x256xf32>, vector<2x128xf32> -> vector<2x128xf32>
    %c1_12 = arith.constant 1 : index
    %c0_13 = arith.constant 0 : index
    %c0_14 = arith.constant 0 : index
    %13 = vector.load %arg4[%c1_12, %c0_13, %c0_14] : memref<4x128x512xf32, #tpu.memory_space<vmem>>, vector<1x128x512xf32>
    %14 = vector.shape_cast %13 : vector<1x128x512xf32> to vector<128x512xf32>
    %cst_15 = arith.constant dense<0.000000e+00> : vector<2x512xf32>
    %15 = tpu.matmul %12, %14, %cst_15 {dimension_numbers = #tpu.dot_dimension_numbers<[1], [0], [0], [1], [0, 0, 1, 1], [], []>} : vector<2x128xf32>, vector<128x512xf32>, vector<2x512xf32> -> vector<2x512xf32>
    %16 = arith.addf %9, %15 : vector<2x512xf32>
    %c2 = arith.constant 2 : index
    %c0_16 = arith.constant 0 : index
    %c0_17 = arith.constant 0 : index
    %17 = vector.load %arg3[%c2, %c0_16, %c0_17] : memref<4x2x256xf32, #tpu.memory_space<vmem>>, vector<1x2x256xf32>
    %18 = vector.shape_cast %17 : vector<1x2x256xf32> to vector<2x256xf32>
    %cst_18 = arith.constant dense<0.000000e+00> : vector<2x128xf32>
    %19 = tpu.matmul %18, %3, %cst_18 {dimension_numbers = #tpu.dot_dimension_numbers<[1], [1], [0], [0], [0, 0, 1, 0], [], []>} : vector<2x256xf32>, vector<128x256xf32>, vector<2x128xf32> -> vector<2x128xf32>
    %c2_19 = arith.constant 2 : index
    %c0_20 = arith.constant 0 : index
    %c0_21 = arith.constant 0 : index
    %20 = vector.load %arg4[%c2_19, %c0_20, %c0_21] : memref<4x128x512xf32, #tpu.memory_space<vmem>>, vector<1x128x512xf32>
    %21 = vector.shape_cast %20 : vector<1x128x512xf32> to vector<128x512xf32>
    %cst_22 = arith.constant dense<0.000000e+00> : vector<2x512xf32>
    %22 = tpu.matmul %19, %21, %cst_22 {dimension_numbers = #tpu.dot_dimension_numbers<[1], [0], [0], [1], [0, 0, 1, 1], [], []>} : vector<2x128xf32>, vector<128x512xf32>, vector<2x512xf32> -> vector<2x512xf32>
    %23 = arith.addf %16, %22 : vector<2x512xf32>
    %c3 = arith.constant 3 : index
    %c0_23 = arith.constant 0 : index
    %c0_24 = arith.constant 0 : index
    %24 = vector.load %arg3[%c3, %c0_23, %c0_24] : memref<4x2x256xf32, #tpu.memory_space<vmem>>, vector<1x2x256xf32>
    %25 = vector.shape_cast %24 : vector<1x2x256xf32> to vector<2x256xf32>
    %cst_25 = arith.constant dense<0.000000e+00> : vector<2x128xf32>
    %26 = tpu.matmul %25, %3, %cst_25 {dimension_numbers = #tpu.dot_dimension_numbers<[1], [1], [0], [0], [0, 0, 1, 0], [], []>} : vector<2x256xf32>, vector<128x256xf32>, vector<2x128xf32> -> vector<2x128xf32>
    %c3_26 = arith.constant 3 : index
    %c0_27 = arith.constant 0 : index
    %c0_28 = arith.constant 0 : index
    %27 = vector.load %arg4[%c3_26, %c0_27, %c0_28] : memref<4x128x512xf32, #tpu.memory_space<vmem>>, vector<1x128x512xf32>
    %28 = vector.shape_cast %27 : vector<1x128x512xf32> to vector<128x512xf32>
    %cst_29 = arith.constant dense<0.000000e+00> : vector<2x512xf32>
    %29 = tpu.matmul %26, %28, %cst_29 {dimension_numbers = #tpu.dot_dimension_numbers<[1], [0], [0], [1], [0, 0, 1, 1], [], []>} : vector<2x128xf32>, vector<128x512xf32>, vector<2x512xf32> -> vector<2x512xf32>
    %30 = arith.addf %23, %29 : vector<2x512xf32>
    %c0_30 = arith.constant 0 : index
    %c0_31 = arith.constant 0 : index
    %31 = vector.load %arg7[%c0_30, %c0_31] : memref<2x512xf32, #tpu.memory_space<vmem>>, vector<2x512xf32>
    %32 = arith.addf %31, %30 : vector<2x512xf32>
    %c0_32 = arith.constant 0 : index
    %c0_33 = arith.constant 0 : index
    %33 = vector.load %arg7[%c0_32, %c0_33] : memref<2x512xf32, #tpu.memory_space<vmem>>, vector<2x512xf32>
    tpu.vector_store %arg7[%c0_32, %c0_33], %32 {strides = array<i32>} : memref<2x512xf32, #tpu.memory_space<vmem>>, vector<2x512xf32>,
    %c1_i32 = arith.constant 1 : i32
    %34 = arith.cmpi eq, %arg1, %c1_i32 : i32
    %35 = arith.extui %34 : i1 to i32
    %c0_i32_34 = arith.constant 0 : i32
    %36 = arith.cmpi ne, %35, %c0_i32_34 : i32
    scf.if %36 {
      %c0_35 = arith.constant 0 : index
      %c0_36 = arith.constant 0 : index
      %37 = vector.load %arg7[%c0_35, %c0_36] : memref<2x512xf32, #tpu.memory_space<vmem>>, vector<2x512xf32>
      %c0_37 = arith.constant 0 : index
      %c0_38 = arith.constant 0 : index
      %38 = vector.load %arg5[%c0_37, %c0_38] : memref<1x512xf32, #tpu.memory_space<vmem>>, vector<1x512xf32>
      %39 = vector.broadcast %38 : vector<1x512xf32> to vector<2x512xf32>
      %40 = arith.addf %37, %39 : vector<2x512xf32>
      %cst_39 = arith.constant 0.000000e+00 : f32
      %41 = vector.broadcast %cst_39 : f32 to vector<2x512xf32>
      %42 = arith.maximumf %40, %41 : vector<2x512xf32>
      %c0_40 = arith.constant 0 : index
      %c0_41 = arith.constant 0 : index
      %43 = vector.load %arg6[%c0_40, %c0_41] : memref<2x512xf32, #tpu.memory_space<vmem>>, vector<2x512xf32>
      tpu.vector_store %arg6[%c0_40, %c0_41], %42 {strides = array<i32>} : memref<2x512xf32, #tpu.memory_space<vmem>>, vector<2x512xf32>,
    } else {
    }
    return
  }
  func.func @transform_0(%arg0: i32, %arg1: i32) -> (i32, i32) {
    %c0_i32 = arith.constant 0 : i32
    %c0_i32_0 = arith.constant 0 : i32
    return %arg1, %c0_i32 : i32, i32
  }
  func.func @transform_1(%arg0: i32, %arg1: i32) -> (i32, i32, i32) {
    %c0_i32 = arith.constant 0 : i32
    %c0_i32_0 = arith.constant 0 : i32
    %c0_i32_1 = arith.constant 0 : i32
    %c0_i32_2 = arith.constant 0 : i32
    return %c0_i32, %c0_i32_0, %c0_i32_1 : i32, i32, i32
  }
  func.func @transform_2(%arg0: i32, %arg1: i32) -> (i32, i32, i32) {
    %c0_i32 = arith.constant 0 : i32
    %c0_i32_0 = arith.constant 0 : i32
    return %c0_i32, %arg1, %arg0 : i32, i32, i32
  }
  func.func @transform_3(%arg0: i32, %arg1: i32) -> (i32, i32) {
    %c0_i32 = arith.constant 0 : i32
    %c0_i32_0 = arith.constant 0 : i32
    return %c0_i32, %arg0 : i32, i32
  }
  func.func @transform_4(%arg0: i32, %arg1: i32) -> (i32, i32) {
    %c0_i32 = arith.constant 0 : i32
    %c0_i32_0 = arith.constant 0 : i32
    return %c0_i32, %arg0 : i32, i32
  }
}

</mosaic_0001>

<bundles_post_ra>
// kernel: graph_conv_forward.1
= control target key start
LH: loop header
LB: loop body
LE: loop exit
PB: predicated region body
PF: predicated region fallthrough
CT: control target
= control target key end

     0   :  { %s4166_s0 = inlined_call_operand.vmem [shape: f32[256,256], index: 0, kind: input, shape index: {}]   ;;  %s4167_s1 = inlined_call_operand.vmem [shape: f32[4,2,256], index: 1, kind: input, shape index: {}]   ;;  %s4168_s2 = inlined_call_operand.vmem [shape: f32[4,256,1024], index: 2, kind: input, shape index: {}]   ;;  %s4169_s3 = inlined_call_operand.vmem [shape: f32[1,1024], index: 3, kind: input, shape index: {}]   ;;  %s4170_s4 = inlined_call_operand.hbm [shape: f32[2,1024], index: 4, kind: output, shape index: {}]  }
   0x1   :  { %4173 = sst [smem:[#allocation8_spill]] %s4168_s2 }
   0x2   :  { %9 = vsyncpa [#allocation5], 0 }
   0x3   :  { %11 = vsyncpa [#allocation5 + $0x1], 0  ;;  %s3029_s15 = smov 0   ;;  %s3031_s16 = smov 0  }
   0x4   :  { %s3033_s17 = smov 0   ;;  %s3035_s18 = smov 0  }
   0x5   :  { %s3037_s19 = smov 0   ;;  %s3039_s20 = smov 0  }
   0x6   :  { %s3041_s21 = smov 0   ;;  %s3043_s22 = smov 0  }
   0x7   :  { %s3045_s23 = smov 0   ;;  %s3047_s24 = smov 0  }
   0x8 LB: > { %s2177_s25 = sadd.s32 4294967295, %s2998_s24   ;;  %s2178_s26 = sadd.s32 4294967294, %s2998_s24   ;;  %s2998_s24 = sphi %s3047_s24, %s17_s24   ;;  %s2994_s23 = sphi %s3045_s23, %s4189_s23   ;;  %s2990_s22 = sphi %s3043_s22, %s4188_s22   ;;  %s2986_s21 = sphi %s3041_s21, %s4187_s21   ;;  %s2982_s20 = sphi %s3039_s20, %s4186_s20   ;;  %s2978_s19 = sphi %s3037_s19, %s4185_s19   ;;  %s2974_s18 = sphi %s3035_s18, %s4184_s18   ;;  %s2970_s17 = sphi %s3033_s17, %s4183_s17   ;;  %s2966_s16 = sphi %s3031_s16, %s4182_s16   ;;  %s2962_s15 = sphi %s3029_s15, %s4181_s15  }
   0x9   : > { %s26_s27 = sadd.s32 1, %s2990_s22  ;;  %s29_s28 = sadd.s32 1, %s2994_s23 }
   0xa   : > { %p27_p0 = scmp.ge.s32.totalorder %s26_s27, 2  ;;  %s85_s29 = sadd.s32 1, %s2978_s19 }
   0xb   : > { %p92_p1 = scmp.ne.s32.totalorder %s2978_s19, %s2974_s18  ;;  %p93_p2 = scmp.eq.s32.totalorder %s2998_s24, 0 }
   0xc   : > { %s4191_s27 = smov (%p27_p0, %s26_s27), 0  ;;  %s4193_s28 = smov (!%p27_p0, %s29_s28), %s2994_s23 }
   0xd   : > { %s80_s30 = ssub.s32 %s2990_s22, %s4191_s27  ;;  %p3092_p3 = por %p93_p2, %p92_p1 }
   0xe   : > { %p31_p4 = scmp.ge.s32.totalorder %s4193_s28, 2  ;;  %s137_s6 = sadd.s32 1, %s2970_s17 }
   0xf   : > { %p147_p5 = scmp.ne.s32.totalorder %s2970_s17, %s2966_s16  ;;  %p148_p6 = scmp.eq.s32.totalorder %s2177_s25, 3 }
  0x10   : > { %s4195_s28 = smov (%p31_p4, %s4193_s28), 0  ;;  %p153_p8 = scmp.ne.s32.totalorder %s2966_s16, %s2962_s15 }
  0x11   : > { %4175 = sst [smem:[#allocation7_spill]] %s4195_s28  ;;  %p3101_p7 = por %p148_p6, %p147_p5 }
  0x12   : > { %s81_s8 = ssub.s32 %s2994_s23, %s4195_s28  ;;  %p154_p9 = scmp.eq.s32.totalorder %s2178_s26, 3 }
  0x13   : > { %s82_s9 = sor.u32 %s81_s8, %s80_s30  ;;  %p135_p10 = scmp.eq.s32.totalorder %s81_s8, 0 }
  0x14   : > { %p83_p11 = scmp.eq.s32.totalorder %s82_s9, 0  ;;  %p3109_p12 = por %p154_p9, %p153_p8 }
  0x15   : > { %s3114_s11 = scalar_select %p135_p10, %s2970_s17, %s137_s6  }
  0x16   : > { %s3117_s12 = scalar_select %p83_p11, %s2978_s19, %s85_s29  }
  0x17   : > { %p2180_p13 = scmp.ge.s32.totalorder %s2998_s24, 4 }
  0x19   : > { %173 = sbr.rel (%p2180_p13) target bundleno = 170 (0xaa), region = 20 }
  0x20   : > { %186 = sbr.rel (!%p3092_p3) target bundleno = 170 (0xaa), region = 28  ;;  %s188_s13 = sand.u32 (%p3092_p3), 1, %s2978_s19  }
  0x21   : > { %s2183_s14 = sshll.u32 (%p3092_p3), %s2994_s23, 2  ;;  %s2181_s25 = sshll.u32 (%p3092_p3), %s188_s13, 11 }
  0x22   : > { %s2399_s26 = sshll.u32 (%p3092_p3), %s2990_s22, 7  ;;  %s4178_s2 = sld [smem:[#allocation8_spill]] (%p3092_p3) }
  0x23   : > { %s194_s30 = sadd.s32 (%p3092_p3), %s2399_s26, %s2183_s14  ;;  %s3133_s5 = scalar_lea.vmem (%p3092_p3), [#allocation3], %s2181_s25 }
  0x24   : > { %s2185_s8 = sshll.u32 (%p3092_p3), %s194_s30, 3 }
  0x28   : > { %s3128_s29 = scalar_lea.vmem %s4178_s2, %s2185_s8 }
  0x29   : > { %v209_v0 = vld [vmem:[%s3128_s29] sm:$0xff]  ;;  %v211_v1 = vld [vmem:[%s3128_s29 + $0x8] sm:$0xff]  ;;  %v213_v2 = vld [vmem:[%s3128_s29 + $0x10] sm:$0xff] }
  0x2a   : > { %210 = vst [vmem:[%s3133_s5] sm:$0xff] %v209_v0  ;;  %212 = vst [vmem:[%s3133_s5 + $0x8] sm:$0xff] %v211_v1  ;;  %v215_v3 = vld [vmem:[%s3128_s29 + $0x18] sm:$0xff]  ;;  %v217_v4 = vld [vmem:[%s3128_s29 + $0x40] sm:$0xff] }
  0x2b   : > { %214 = vst [vmem:[%s3133_s5 + $0x10] sm:$0xff] %v213_v2  ;;  %v219_v5 = vld [vmem:[%s3128_s29 + $0x48] sm:$0xff]  ;;  %216 = vst [vmem:[%s3133_s5 + $0x18] sm:$0xff] %v215_v3  ;;  %v221_v6 = vld [vmem:[%s3128_s29 + $0x50] sm:$0xff] }
  0x2c   : > { %218 = vst [vmem:[%s3133_s5 + $0x20] sm:$0xff] %v217_v4  ;;  %220 = vst [vmem:[%s3133_s5 + $0x28] sm:$0xff] %v219_v5  ;;  %v223_v7 = vld [vmem:[%s3128_s29 + $0x58] sm:$0xff]  ;;  %v225_v8 = vld [vmem:[%s3128_s29 + $0x80] sm:$0xff] }
  0x2d   : > { %222 = vst [vmem:[%s3133_s5 + $0x30] sm:$0xff] %v221_v6  ;;  %224 = vst [vmem:[%s3133_s5 + $0x38] sm:$0xff] %v223_v7  ;;  %v227_v9 = vld [vmem:[%s3128_s29 + $0x88] sm:$0xff]  ;;  %v229_v10 = vld [vmem:[%s3128_s29 + $0x90] sm:$0xff] }
  0x2e   : > { %226 = vst [vmem:[%s3133_s5 + $0x40] sm:$0xff] %v225_v8  ;;  %v231_v11 = vld [vmem:[%s3128_s29 + $0x98] sm:$0xff]  ;;  %228 = vst [vmem:[%s3133_s5 + $0x48] sm:$0xff] %v227_v9  ;;  %v233_v12 = vld [vmem:[%s3128_s29 + $0xc0] sm:$0xff] }
  0x2f   : > { %230 = vst [vmem:[%s3133_s5 + $0x50] sm:$0xff] %v229_v10  ;;  %232 = vst [vmem:[%s3133_s5 + $0x58] sm:$0xff] %v231_v11  ;;  %v235_v13 = vld [vmem:[%s3128_s29 + $0xc8] sm:$0xff]  ;;  %v237_v14 = vld [vmem:[%s3128_s29 + $0xd0] sm:$0xff] }
  0x30   : > { %234 = vst [vmem:[%s3133_s5 + $0x60] sm:$0xff] %v233_v12  ;;  %236 = vst [vmem:[%s3133_s5 + $0x68] sm:$0xff] %v235_v13  ;;  %v239_v15 = vld [vmem:[%s3128_s29 + $0xd8] sm:$0xff]  ;;  %v241_v16 = vld [vmem:[%s3128_s29 + $0x100] sm:$0xff] }
  0x31   : > { %238 = vst [vmem:[%s3133_s5 + $0x70] sm:$0xff] %v237_v14  ;;  %v243_v17 = vld [vmem:[%s3128_s29 + $0x108] sm:$0xff]  ;;  %240 = vst [vmem:[%s3133_s5 + $0x78] sm:$0xff] %v239_v15  ;;  %v245_v18 = vld [vmem:[%s3128_s29 + $0x110] sm:$0xff] }
  0x32   : > { %242 = vst [vmem:[%s3133_s5 + $0x80] sm:$0xff] %v241_v16  ;;  %244 = vst [vmem:[%s3133_s5 + $0x88] sm:$0xff] %v243_v17  ;;  %v247_v19 = vld [vmem:[%s3128_s29 + $0x118] sm:$0xff]  ;;  %v249_v20 = vld [vmem:[%s3128_s29 + $0x140] sm:$0xff] }
  0x33   : > { %246 = vst [vmem:[%s3133_s5 + $0x90] sm:$0xff] %v245_v18  ;;  %248 = vst [vmem:[%s3133_s5 + $0x98] sm:$0xff] %v247_v19  ;;  %v251_v21 = vld [vmem:[%s3128_s29 + $0x148] sm:$0xff]  ;;  %v253_v22 = vld [vmem:[%s3128_s29 + $0x150] sm:$0xff] }
  0x34   : > { %250 = vst [vmem:[%s3133_s5 + $0xa0] sm:$0xff] %v249_v20  ;;  %v255_v23 = vld [vmem:[%s3128_s29 + $0x158] sm:$0xff]  ;;  %252 = vst [vmem:[%s3133_s5 + $0xa8] sm:$0xff] %v251_v21  ;;  %v257_v24 = vld [vmem:[%s3128_s29 + $0x180] sm:$0xff] }
  0x35   : > { %254 = vst [vmem:[%s3133_s5 + $0xb0] sm:$0xff] %v253_v22  ;;  %256 = vst [vmem:[%s3133_s5 + $0xb8] sm:$0xff] %v255_v23  ;;  %v259_v25 = vld [vmem:[%s3128_s29 + $0x188] sm:$0xff]  ;;  %v261_v26 = vld [vmem:[%s3128_s29 + $0x190] sm:$0xff] }
  0x36   : > { %258 = vst [vmem:[%s3133_s5 + $0xc0] sm:$0xff] %v257_v24  ;;  %260 = vst [vmem:[%s3133_s5 + $0xc8] sm:$0xff] %v259_v25  ;;  %v263_v27 = vld [vmem:[%s3128_s29 + $0x198] sm:$0xff]  ;;  %v265_v28 = vld [vmem:[%s3128_s29 + $0x1c0] sm:$0xff] }
  0x37   : > { %262 = vst [vmem:[%s3133_s5 + $0xd0] sm:$0xff] %v261_v26  ;;  %v267_v29 = vld [vmem:[%s3128_s29 + $0x1c8] sm:$0xff]  ;;  %264 = vst [vmem:[%s3133_s5 + $0xd8] sm:$0xff] %v263_v27  ;;  %v269_v30 = vld [vmem:[%s3128_s29 + $0x1d0] sm:$0xff] }
  0x38   : > { %266 = vst [vmem:[%s3133_s5 + $0xe0] sm:$0xff] %v265_v28  ;;  %268 = vst [vmem:[%s3133_s5 + $0xe8] sm:$0xff] %v267_v29  ;;  %v271_v31 = vld [vmem:[%s3128_s29 + $0x1d8] sm:$0xff]  ;;  %v273_v32 = vld [vmem:[%s3128_s29 + $0x200] sm:$0xff] }
  0x39   : > { %270 = vst [vmem:[%s3133_s5 + $0xf0] sm:$0xff] %v269_v30  ;;  %272 = vst [vmem:[%s3133_s5 + $0xf8] sm:$0xff] %v271_v31  ;;  %v275_v33 = vld [vmem:[%s3128_s29 + $0x208] sm:$0xff]  ;;  %v277_v34 = vld [vmem:[%s3128_s29 + $0x210] sm:$0xff] }
  0x3a   : > { %274 = vst [vmem:[%s3133_s5 + $0x100] sm:$0xff] %v273_v32  ;;  %v279_v35 = vld [vmem:[%s3128_s29 + $0x218] sm:$0xff]  ;;  %276 = vst [vmem:[%s3133_s5 + $0x108] sm:$0xff] %v275_v33  ;;  %v281_v36 = vld [vmem:[%s3128_s29 + $0x240] sm:$0xff] }
  0x3b   : > { %278 = vst [vmem:[%s3133_s5 + $0x110] sm:$0xff] %v277_v34  ;;  %280 = vst [vmem:[%s3133_s5 + $0x118] sm:$0xff] %v279_v35  ;;  %v283_v37 = vld [vmem:[%s3128_s29 + $0x248] sm:$0xff]  ;;  %v285_v38 = vld [vmem:[%s3128_s29 + $0x250] sm:$0xff] }
  0x3c   : > { %282 = vst [vmem:[%s3133_s5 + $0x120] sm:$0xff] %v281_v36  ;;  %284 = vst [vmem:[%s3133_s5 + $0x128] sm:$0xff] %v283_v37  ;;  %v287_v39 = vld [vmem:[%s3128_s29 + $0x258] sm:$0xff]  ;;  %v289_v40 = vld [vmem:[%s3128_s29 + $0x280] sm:$0xff] }
  0x3d   : > { %286 = vst [vmem:[%s3133_s5 + $0x130] sm:$0xff] %v285_v38  ;;  %v291_v41 = vld [vmem:[%s3128_s29 + $0x288] sm:$0xff]  ;;  %288 = vst [vmem:[%s3133_s5 + $0x138] sm:$0xff] %v287_v39  ;;  %v293_v42 = vld [vmem:[%s3128_s29 + $0x290] sm:$0xff] }
  0x3e   : > { %290 = vst [vmem:[%s3133_s5 + $0x140] sm:$0xff] %v289_v40  ;;  %292 = vst [vmem:[%s3133_s5 + $0x148] sm:$0xff] %v291_v41  ;;  %v295_v43 = vld [vmem:[%s3128_s29 + $0x298] sm:$0xff]  ;;  %v297_v44 = vld [vmem:[%s3128_s29 + $0x2c0] sm:$0xff] }
  0x3f   : > { %294 = vst [vmem:[%s3133_s5 + $0x150] sm:$0xff] %v293_v42  ;;  %296 = vst [vmem:[%s3133_s5 + $0x158] sm:$0xff] %v295_v43  ;;  %v299_v45 = vld [vmem:[%s3128_s29 + $0x2c8] sm:$0xff]  ;;  %v301_v46 = vld [vmem:[%s3128_s29 + $0x2d0] sm:$0xff] }
  0x40   : > { %298 = vst [vmem:[%s3133_s5 + $0x160] sm:$0xff] %v297_v44  ;;  %v303_v47 = vld [vmem:[%s3128_s29 + $0x2d8] sm:$0xff]  ;;  %300 = vst [vmem:[%s3133_s5 + $0x168] sm:$0xff] %v299_v45  ;;  %v305_v48 = vld [vmem:[%s3128_s29 + $0x300] sm:$0xff] }
  0x41   : > { %302 = vst [vmem:[%s3133_s5 + $0x170] sm:$0xff] %v301_v46  ;;  %304 = vst [vmem:[%s3133_s5 + $0x178] sm:$0xff] %v303_v47  ;;  %v307_v49 = vld [vmem:[%s3128_s29 + $0x308] sm:$0xff]  ;;  %v309_v50 = vld [vmem:[%s3128_s29 + $0x310] sm:$0xff] }
  0x42   : > { %306 = vst [vmem:[%s3133_s5 + $0x180] sm:$0xff] %v305_v48  ;;  %308 = vst [vmem:[%s3133_s5 + $0x188] sm:$0xff] %v307_v49  ;;  %v311_v51 = vld [vmem:[%s3128_s29 + $0x318] sm:$0xff]  ;;  %v313_v52 = vld [vmem:[%s3128_s29 + $0x340] sm:$0xff] }
  0x43   : > { %310 = vst [vmem:[%s3133_s5 + $0x190] sm:$0xff] %v309_v50  ;;  %v315_v53 = vld [vmem:[%s3128_s29 + $0x348] sm:$0xff]  ;;  %312 = vst [vmem:[%s3133_s5 + $0x198] sm:$0xff] %v311_v51  ;;  %v317_v54 = vld [vmem:[%s3128_s29 + $0x350] sm:$0xff] }
  0x44   : > { %314 = vst [vmem:[%s3133_s5 + $0x1a0] sm:$0xff] %v313_v52  ;;  %316 = vst [vmem:[%s3133_s5 + $0x1a8] sm:$0xff] %v315_v53  ;;  %v319_v55 = vld [vmem:[%s3128_s29 + $0x358] sm:$0xff]  ;;  %v321_v56 = vld [vmem:[%s3128_s29 + $0x380] sm:$0xff] }
  0x45   : > { %318 = vst [vmem:[%s3133_s5 + $0x1b0] sm:$0xff] %v317_v54  ;;  %320 = vst [vmem:[%s3133_s5 + $0x1b8] sm:$0xff] %v319_v55  ;;  %v323_v57 = vld [vmem:[%s3128_s29 + $0x388] sm:$0xff]  ;;  %v325_v58 = vld [vmem:[%s3128_s29 + $0x390] sm:$0xff] }
  0x46   : > { %322 = vst [vmem:[%s3133_s5 + $0x1c0] sm:$0xff] %v321_v56  ;;  %v327_v59 = vld [vmem:[%s3128_s29 + $0x398] sm:$0xff]  ;;  %324 = vst [vmem:[%s3133_s5 + $0x1c8] sm:$0xff] %v323_v57  ;;  %v329_v60 = vld [vmem:[%s3128_s29 + $0x3c0] sm:$0xff] }
  0x47   : > { %326 = vst [vmem:[%s3133_s5 + $0x1d0] sm:$0xff] %v325_v58  ;;  %328 = vst [vmem:[%s3133_s5 + $0x1d8] sm:$0xff] %v327_v59  ;;  %v331_v61 = vld [vmem:[%s3128_s29 + $0x3c8] sm:$0xff]  ;;  %v333_v62 = vld [vmem:[%s3128_s29 + $0x3d0] sm:$0xff] }
  0x48   : > { %330 = vst [vmem:[%s3133_s5 + $0x1e0] sm:$0xff] %v329_v60  ;;  %332 = vst [vmem:[%s3133_s5 + $0x1e8] sm:$0xff] %v331_v61  ;;  %v335_v63 = vld [vmem:[%s3128_s29 + $0x3d8] sm:$0xff]  ;;  %v337_v0 = vld [vmem:[%s3128_s29 + $0x800] sm:$0xff] }
  0x49   : > { %334 = vst [vmem:[%s3133_s5 + $0x1f0] sm:$0xff] %v333_v62  ;;  %v339_v1 = vld [vmem:[%s3128_s29 + $0x808] sm:$0xff]  ;;  %336 = vst [vmem:[%s3133_s5 + $0x1f8] sm:$0xff] %v335_v63  ;;  %v341_v2 = vld [vmem:[%s3128_s29 + $0x810] sm:$0xff] }
  0x4a   : > { %338 = vst [vmem:[%s3133_s5 + $0x200] sm:$0xff] %v337_v0  ;;  %340 = vst [vmem:[%s3133_s5 + $0x208] sm:$0xff] %v339_v1  ;;  %v343_v3 = vld [vmem:[%s3128_s29 + $0x818] sm:$0xff]  ;;  %v345_v4 = vld [vmem:[%s3128_s29 + $0x840] sm:$0xff] }
  0x4b   : > { %342 = vst [vmem:[%s3133_s5 + $0x210] sm:$0xff] %v341_v2  ;;  %344 = vst [vmem:[%s3133_s5 + $0x218] sm:$0xff] %v343_v3  ;;  %v347_v5 = vld [vmem:[%s3128_s29 + $0x848] sm:$0xff]  ;;  %v349_v6 = vld [vmem:[%s3128_s29 + $0x850] sm:$0xff] }
  0x4c   : > { %346 = vst [vmem:[%s3133_s5 + $0x220] sm:$0xff] %v345_v4  ;;  %v351_v7 = vld [vmem:[%s3128_s29 + $0x858] sm:$0xff]  ;;  %348 = vst [vmem:[%s3133_s5 + $0x228] sm:$0xff] %v347_v5  ;;  %v353_v8 = vld [vmem:[%s3128_s29 + $0x880] sm:$0xff] }
  0x4d   : > { %350 = vst [vmem:[%s3133_s5 + $0x230] sm:$0xff] %v349_v6  ;;  %352 = vst [vmem:[%s3133_s5 + $0x238] sm:$0xff] %v351_v7  ;;  %v355_v9 = vld [vmem:[%s3128_s29 + $0x888] sm:$0xff]  ;;  %v357_v10 = vld [vmem:[%s3128_s29 + $0x890] sm:$0xff] }
  0x4e   : > { %354 = vst [vmem:[%s3133_s5 + $0x240] sm:$0xff] %v353_v8  ;;  %356 = vst [vmem:[%s3133_s5 + $0x248] sm:$0xff] %v355_v9  ;;  %v359_v11 = vld [vmem:[%s3128_s29 + $0x898] sm:$0xff]  ;;  %v361_v12 = vld [vmem:[%s3128_s29 + $0x8c0] sm:$0xff] }
  0x4f   : > { %358 = vst [vmem:[%s3133_s5 + $0x250] sm:$0xff] %v357_v10  ;;  %v363_v13 = vld [vmem:[%s3128_s29 + $0x8c8] sm:$0xff]  ;;  %360 = vst [vmem:[%s3133_s5 + $0x258] sm:$0xff] %v359_v11  ;;  %v365_v14 = vld [vmem:[%s3128_s29 + $0x8d0] sm:$0xff] }
  0x50   : > { %362 = vst [vmem:[%s3133_s5 + $0x260] sm:$0xff] %v361_v12  ;;  %364 = vst [vmem:[%s3133_s5 + $0x268] sm:$0xff] %v363_v13  ;;  %v367_v15 = vld [vmem:[%s3128_s29 + $0x8d8] sm:$0xff]  ;;  %v369_v16 = vld [vmem:[%s3128_s29 + $0x900] sm:$0xff] }
  0x51   : > { %366 = vst [vmem:[%s3133_s5 + $0x270] sm:$0xff] %v365_v14  ;;  %368 = vst [vmem:[%s3133_s5 + $0x278] sm:$0xff] %v367_v15  ;;  %v371_v17 = vld [vmem:[%s3128_s29 + $0x908] sm:$0xff]  ;;  %v373_v18 = vld [vmem:[%s3128_s29 + $0x910] sm:$0xff] }
  0x52   : > { %370 = vst [vmem:[%s3133_s5 + $0x280] sm:$0xff] %v369_v16  ;;  %v375_v19 = vld [vmem:[%s3128_s29 + $0x918] sm:$0xff]  ;;  %372 = vst [vmem:[%s3133_s5 + $0x288] sm:$0xff] %v371_v17  ;;  %v377_v20 = vld [vmem:[%s3128_s29 + $0x940] sm:$0xff] }
  0x53   : > { %374 = vst [vmem:[%s3133_s5 + $0x290] sm:$0xff] %v373_v18  ;;  %376 = vst [vmem:[%s3133_s5 + $0x298] sm:$0xff] %v375_v19  ;;  %v379_v21 = vld [vmem:[%s3128_s29 + $0x948] sm:$0xff]  ;;  %v381_v22 = vld [vmem:[%s3128_s29 + $0x950] sm:$0xff] }
  0x54   : > { %378 = vst [vmem:[%s3133_s5 + $0x2a0] sm:$0xff] %v377_v20  ;;  %380 = vst [vmem:[%s3133_s5 + $0x2a8] sm:$0xff] %v379_v21  ;;  %v383_v23 = vld [vmem:[%s3128_s29 + $0x958] sm:$0xff]  ;;  %v385_v24 = vld [vmem:[%s3128_s29 + $0x980] sm:$0xff] }
  0x55   : > { %382 = vst [vmem:[%s3133_s5 + $0x2b0] sm:$0xff] %v381_v22  ;;  %v387_v25 = vld [vmem:[%s3128_s29 + $0x988] sm:$0xff]  ;;  %384 = vst [vmem:[%s3133_s5 + $0x2b8] sm:$0xff] %v383_v23  ;;  %v389_v26 = vld [vmem:[%s3128_s29 + $0x990] sm:$0xff] }
  0x56   : > { %386 = vst [vmem:[%s3133_s5 + $0x2c0] sm:$0xff] %v385_v24  ;;  %388 = vst [vmem:[%s3133_s5 + $0x2c8] sm:$0xff] %v387_v25  ;;  %v391_v27 = vld [vmem:[%s3128_s29 + $0x998] sm:$0xff]  ;;  %v393_v28 = vld [vmem:[%s3128_s29 + $0x9c0] sm:$0xff] }
  0x57   : > { %390 = vst [vmem:[%s3133_s5 + $0x2d0] sm:$0xff] %v389_v26  ;;  %392 = vst [vmem:[%s3133_s5 + $0x2d8] sm:$0xff] %v391_v27  ;;  %v395_v29 = vld [vmem:[%s3128_s29 + $0x9c8] sm:$0xff]  ;;  %v397_v30 = vld [vmem:[%s3128_s29 + $0x9d0] sm:$0xff] }
  0x58   : > { %394 = vst [vmem:[%s3133_s5 + $0x2e0] sm:$0xff] %v393_v28  ;;  %v399_v31 = vld [vmem:[%s3128_s29 + $0x9d8] sm:$0xff]  ;;  %396 = vst [vmem:[%s3133_s5 + $0x2e8] sm:$0xff] %v395_v29  ;;  %v401_v32 = vld [vmem:[%s3128_s29 + $0xa00] sm:$0xff] }
  0x59   : > { %398 = vst [vmem:[%s3133_s5 + $0x2f0] sm:$0xff] %v397_v30  ;;  %400 = vst [vmem:[%s3133_s5 + $0x2f8] sm:$0xff] %v399_v31  ;;  %v403_v33 = vld [vmem:[%s3128_s29 + $0xa08] sm:$0xff]  ;;  %v405_v34 = vld [vmem:[%s3128_s29 + $0xa10] sm:$0xff] }
  0x5a   : > { %402 = vst [vmem:[%s3133_s5 + $0x300] sm:$0xff] %v401_v32  ;;  %404 = vst [vmem:[%s3133_s5 + $0x308] sm:$0xff] %v403_v33  ;;  %v407_v35 = vld [vmem:[%s3128_s29 + $0xa18] sm:$0xff]  ;;  %v409_v36 = vld [vmem:[%s3128_s29 + $0xa40] sm:$0xff] }
  0x5b   : > { %406 = vst [vmem:[%s3133_s5 + $0x310] sm:$0xff] %v405_v34  ;;  %v411_v37 = vld [vmem:[%s3128_s29 + $0xa48] sm:$0xff]  ;;  %408 = vst [vmem:[%s3133_s5 + $0x318] sm:$0xff] %v407_v35  ;;  %v413_v38 = vld [vmem:[%s3128_s29 + $0xa50] sm:$0xff] }
  0x5c   : > { %410 = vst [vmem:[%s3133_s5 + $0x320] sm:$0xff] %v409_v36  ;;  %412 = vst [vmem:[%s3133_s5 + $0x328] sm:$0xff] %v411_v37  ;;  %v415_v39 = vld [vmem:[%s3128_s29 + $0xa58] sm:$0xff]  ;;  %v417_v40 = vld [vmem:[%s3128_s29 + $0xa80] sm:$0xff] }
  0x5d   : > { %414 = vst [vmem:[%s3133_s5 + $0x330] sm:$0xff] %v413_v38  ;;  %416 = vst [vmem:[%s3133_s5 + $0x338] sm:$0xff] %v415_v39  ;;  %v419_v41 = vld [vmem:[%s3128_s29 + $0xa88] sm:$0xff]  ;;  %v421_v42 = vld [vmem:[%s3128_s29 + $0xa90] sm:$0xff] }
  0x5e   : > { %418 = vst [vmem:[%s3133_s5 + $0x340] sm:$0xff] %v417_v40  ;;  %v423_v43 = vld [vmem:[%s3128_s29 + $0xa98] sm:$0xff]  ;;  %420 = vst [vmem:[%s3133_s5 + $0x348] sm:$0xff] %v419_v41  ;;  %v425_v44 = vld [vmem:[%s3128_s29 + $0xac0] sm:$0xff] }
  0x5f   : > { %422 = vst [vmem:[%s3133_s5 + $0x350] sm:$0xff] %v421_v42  ;;  %424 = vst [vmem:[%s3133_s5 + $0x358] sm:$0xff] %v423_v43  ;;  %v427_v45 = vld [vmem:[%s3128_s29 + $0xac8] sm:$0xff]  ;;  %v429_v46 = vld [vmem:[%s3128_s29 + $0xad0] sm:$0xff] }
  0x60   : > { %426 = vst [vmem:[%s3133_s5 + $0x360] sm:$0xff] %v425_v44  ;;  %428 = vst [vmem:[%s3133_s5 + $0x368] sm:$0xff] %v427_v45  ;;  %v431_v47 = vld [vmem:[%s3128_s29 + $0xad8] sm:$0xff]  ;;  %v433_v48 = vld [vmem:[%s3128_s29 + $0xb00] sm:$0xff] }
  0x61   : > { %430 = vst [vmem:[%s3133_s5 + $0x370] sm:$0xff] %v429_v46  ;;  %v435_v49 = vld [vmem:[%s3128_s29 + $0xb08] sm:$0xff]  ;;  %432 = vst [vmem:[%s3133_s5 + $0x378] sm:$0xff] %v431_v47  ;;  %v437_v50 = vld [vmem:[%s3128_s29 + $0xb10] sm:$0xff] }
  0x62   : > { %434 = vst [vmem:[%s3133_s5 + $0x380] sm:$0xff] %v433_v48  ;;  %436 = vst [vmem:[%s3133_s5 + $0x388] sm:$0xff] %v435_v49  ;;  %v439_v51 = vld [vmem:[%s3128_s29 + $0xb18] sm:$0xff]  ;;  %v441_v52 = vld [vmem:[%s3128_s29 + $0xb40] sm:$0xff] }
  0x63   : > { %438 = vst [vmem:[%s3133_s5 + $0x390] sm:$0xff] %v437_v50  ;;  %440 = vst [vmem:[%s3133_s5 + $0x398] sm:$0xff] %v439_v51  ;;  %v443_v53 = vld [vmem:[%s3128_s29 + $0xb48] sm:$0xff]  ;;  %v445_v54 = vld [vmem:[%s3128_s29 + $0xb50] sm:$0xff] }
  0x64   : > { %442 = vst [vmem:[%s3133_s5 + $0x3a0] sm:$0xff] %v441_v52  ;;  %v447_v55 = vld [vmem:[%s3128_s29 + $0xb58] sm:$0xff]  ;;  %444 = vst [vmem:[%s3133_s5 + $0x3a8] sm:$0xff] %v443_v53  ;;  %v449_v56 = vld [vmem:[%s3128_s29 + $0xb80] sm:$0xff] }
  0x65   : > { %446 = vst [vmem:[%s3133_s5 + $0x3b0] sm:$0xff] %v445_v54  ;;  %448 = vst [vmem:[%s3133_s5 + $0x3b8] sm:$0xff] %v447_v55  ;;  %v451_v57 = vld [vmem:[%s3128_s29 + $0xb88] sm:$0xff]  ;;  %v453_v58 = vld [vmem:[%s3128_s29 + $0xb90] sm:$0xff] }
  0x66   : > { %450 = vst [vmem:[%s3133_s5 + $0x3c0] sm:$0xff] %v449_v56  ;;  %452 = vst [vmem:[%s3133_s5 + $0x3c8] sm:$0xff] %v451_v57  ;;  %v455_v59 = vld [vmem:[%s3128_s29 + $0xb98] sm:$0xff]  ;;  %v457_v60 = vld [vmem:[%s3128_s29 + $0xbc0] sm:$0xff] }
  0x67   : > { %454 = vst [vmem:[%s3133_s5 + $0x3d0] sm:$0xff] %v453_v58  ;;  %v459_v61 = vld [vmem:[%s3128_s29 + $0xbc8] sm:$0xff]  ;;  %456 = vst [vmem:[%s3133_s5 + $0x3d8] sm:$0xff] %v455_v59  ;;  %v461_v62 = vld [vmem:[%s3128_s29 + $0xbd0] sm:$0xff] }
  0x68   : > { %458 = vst [vmem:[%s3133_s5 + $0x3e0] sm:$0xff] %v457_v60  ;;  %460 = vst [vmem:[%s3133_s5 + $0x3e8] sm:$0xff] %v459_v61  ;;  %v463_v63 = vld [vmem:[%s3128_s29 + $0xbd8] sm:$0xff]  ;;  %v465_v0 = vld [vmem:[%s3128_s29 + $0x1000] sm:$0xff] }
  0x69   : > { %462 = vst [vmem:[%s3133_s5 + $0x3f0] sm:$0xff] %v461_v62  ;;  %464 = vst [vmem:[%s3133_s5 + $0x3f8] sm:$0xff] %v463_v63  ;;  %v467_v1 = vld [vmem:[%s3128_s29 + $0x1008] sm:$0xff]  ;;  %v469_v2 = vld [vmem:[%s3128_s29 + $0x1010] sm:$0xff] }
  0x6a   : > { %466 = vst [vmem:[%s3133_s5 + $0x400] sm:$0xff] %v465_v0  ;;  %v471_v3 = vld [vmem:[%s3128_s29 + $0x1018] sm:$0xff]  ;;  %468 = vst [vmem:[%s3133_s5 + $0x408] sm:$0xff] %v467_v1  ;;  %v473_v4 = vld [vmem:[%s3128_s29 + $0x1040] sm:$0xff] }
  0x6b   : > { %470 = vst [vmem:[%s3133_s5 + $0x410] sm:$0xff] %v469_v2  ;;  %472 = vst [vmem:[%s3133_s5 + $0x418] sm:$0xff] %v471_v3  ;;  %v475_v5 = vld [vmem:[%s3128_s29 + $0x1048] sm:$0xff]  ;;  %v477_v6 = vld [vmem:[%s3128_s29 + $0x1050] sm:$0xff] }
  0x6c   : > { %474 = vst [vmem:[%s3133_s5 + $0x420] sm:$0xff] %v473_v4  ;;  %476 = vst [vmem:[%s3133_s5 + $0x428] sm:$0xff] %v475_v5  ;;  %v479_v7 = vld [vmem:[%s3128_s29 + $0x1058] sm:$0xff]  ;;  %v481_v8 = vld [vmem:[%s3128_s29 + $0x1080] sm:$0xff] }
  0x6d   : > { %478 = vst [vmem:[%s3133_s5 + $0x430] sm:$0xff] %v477_v6  ;;  %v483_v9 = vld [vmem:[%s3128_s29 + $0x1088] sm:$0xff]  ;;  %480 = vst [vmem:[%s3133_s5 + $0x438] sm:$0xff] %v479_v7  ;;  %v485_v10 = vld [vmem:[%s3128_s29 + $0x1090] sm:$0xff] }
  0x6e   : > { %482 = vst [vmem:[%s3133_s5 + $0x440] sm:$0xff] %v481_v8  ;;  %484 = vst [vmem:[%s3133_s5 + $0x448] sm:$0xff] %v483_v9  ;;  %v487_v11 = vld [vmem:[%s3128_s29 + $0x1098] sm:$0xff]  ;;  %v489_v12 = vld [vmem:[%s3128_s29 + $0x10c0] sm:$0xff] }
  0x6f   : > { %486 = vst [vmem:[%s3133_s5 + $0x450] sm:$0xff] %v485_v10  ;;  %488 = vst [vmem:[%s3133_s5 + $0x458] sm:$0xff] %v487_v11  ;;  %v491_v13 = vld [vmem:[%s3128_s29 + $0x10c8] sm:$0xff]  ;;  %v493_v14 = vld [vmem:[%s3128_s29 + $0x10d0] sm:$0xff] }
  0x70   : > { %490 = vst [vmem:[%s3133_s5 + $0x460] sm:$0xff] %v489_v12  ;;  %v495_v15 = vld [vmem:[%s3128_s29 + $0x10d8] sm:$0xff]  ;;  %492 = vst [vmem:[%s3133_s5 + $0x468] sm:$0xff] %v491_v13  ;;  %v497_v16 = vld [vmem:[%s3128_s29 + $0x1100] sm:$0xff] }
  0x71   : > { %494 = vst [vmem:[%s3133_s5 + $0x470] sm:$0xff] %v493_v14  ;;  %496 = vst [vmem:[%s3133_s5 + $0x478] sm:$0xff] %v495_v15  ;;  %v499_v17 = vld [vmem:[%s3128_s29 + $0x1108] sm:$0xff]  ;;  %v501_v18 = vld [vmem:[%s3128_s29 + $0x1110] sm:$0xff] }
  0x72   : > { %498 = vst [vmem:[%s3133_s5 + $0x480] sm:$0xff] %v497_v16  ;;  %500 = vst [vmem:[%s3133_s5 + $0x488] sm:$0xff] %v499_v17  ;;  %v503_v19 = vld [vmem:[%s3128_s29 + $0x1118] sm:$0xff]  ;;  %v505_v20 = vld [vmem:[%s3128_s29 + $0x1140] sm:$0xff] }
  0x73   : > { %502 = vst [vmem:[%s3133_s5 + $0x490] sm:$0xff] %v501_v18  ;;  %v507_v21 = vld [vmem:[%s3128_s29 + $0x1148] sm:$0xff]  ;;  %504 = vst [vmem:[%s3133_s5 + $0x498] sm:$0xff] %v503_v19  ;;  %v509_v22 = vld [vmem:[%s3128_s29 + $0x1150] sm:$0xff] }
  0x74   : > { %506 = vst [vmem:[%s3133_s5 + $0x4a0] sm:$0xff] %v505_v20  ;;  %508 = vst [vmem:[%s3133_s5 + $0x4a8] sm:$0xff] %v507_v21  ;;  %v511_v23 = vld [vmem:[%s3128_s29 + $0x1158] sm:$0xff]  ;;  %v513_v24 = vld [vmem:[%s3128_s29 + $0x1180] sm:$0xff] }
  0x75   : > { %510 = vst [vmem:[%s3133_s5 + $0x4b0] sm:$0xff] %v509_v22  ;;  %512 = vst [vmem:[%s3133_s5 + $0x4b8] sm:$0xff] %v511_v23  ;;  %v515_v25 = vld [vmem:[%s3128_s29 + $0x1188] sm:$0xff]  ;;  %v517_v26 = vld [vmem:[%s3128_s29 + $0x1190] sm:$0xff] }
  0x76   : > { %514 = vst [vmem:[%s3133_s5 + $0x4c0] sm:$0xff] %v513_v24  ;;  %v519_v27 = vld [vmem:[%s3128_s29 + $0x1198] sm:$0xff]  ;;  %516 = vst [vmem:[%s3133_s5 + $0x4c8] sm:$0xff] %v515_v25  ;;  %v521_v28 = vld [vmem:[%s3128_s29 + $0x11c0] sm:$0xff] }
  0x77   : > { %518 = vst [vmem:[%s3133_s5 + $0x4d0] sm:$0xff] %v517_v26  ;;  %520 = vst [vmem:[%s3133_s5 + $0x4d8] sm:$0xff] %v519_v27  ;;  %v523_v29 = vld [vmem:[%s3128_s29 + $0x11c8] sm:$0xff]  ;;  %v525_v30 = vld [vmem:[%s3128_s29 + $0x11d0] sm:$0xff] }
  0x78   : > { %522 = vst [vmem:[%s3133_s5 + $0x4e0] sm:$0xff] %v521_v28  ;;  %524 = vst [vmem:[%s3133_s5 + $0x4e8] sm:$0xff] %v523_v29  ;;  %v527_v31 = vld [vmem:[%s3128_s29 + $0x11d8] sm:$0xff]  ;;  %v529_v32 = vld [vmem:[%s3128_s29 + $0x1200] sm:$0xff] }
  0x79   : > { %526 = vst [vmem:[%s3133_s5 + $0x4f0] sm:$0xff] %v525_v30  ;;  %v531_v33 = vld [vmem:[%s3128_s29 + $0x1208] sm:$0xff]  ;;  %528 = vst [vmem:[%s3133_s5 + $0x4f8] sm:$0xff] %v527_v31  ;;  %v533_v34 = vld [vmem:[%s3128_s29 + $0x1210] sm:$0xff] }
  0x7a   : > { %530 = vst [vmem:[%s3133_s5 + $0x500] sm:$0xff] %v529_v32  ;;  %532 = vst [vmem:[%s3133_s5 + $0x508] sm:$0xff] %v531_v33  ;;  %v535_v35 = vld [vmem:[%s3128_s29 + $0x1218] sm:$0xff]  ;;  %v537_v36 = vld [vmem:[%s3128_s29 + $0x1240] sm:$0xff] }
  0x7b   : > { %534 = vst [vmem:[%s3133_s5 + $0x510] sm:$0xff] %v533_v34  ;;  %536 = vst [vmem:[%s3133_s5 + $0x518] sm:$0xff] %v535_v35  ;;  %v539_v37 = vld [vmem:[%s3128_s29 + $0x1248] sm:$0xff]  ;;  %v541_v38 = vld [vmem:[%s3128_s29 + $0x1250] sm:$0xff] }
  0x7c   : > { %538 = vst [vmem:[%s3133_s5 + $0x520] sm:$0xff] %v537_v36  ;;  %v543_v39 = vld [vmem:[%s3128_s29 + $0x1258] sm:$0xff]  ;;  %540 = vst [vmem:[%s3133_s5 + $0x528] sm:$0xff] %v539_v37  ;;  %v545_v40 = vld [vmem:[%s3128_s29 + $0x1280] sm:$0xff] }
  0x7d   : > { %542 = vst [vmem:[%s3133_s5 + $0x530] sm:$0xff] %v541_v38  ;;  %544 = vst [vmem:[%s3133_s5 + $0x538] sm:$0xff] %v543_v39  ;;  %v547_v41 = vld [vmem:[%s3128_s29 + $0x1288] sm:$0xff]  ;;  %v549_v42 = vld [vmem:[%s3128_s29 + $0x1290] sm:$0xff] }
  0x7e   : > { %546 = vst [vmem:[%s3133_s5 + $0x540] sm:$0xff] %v545_v40  ;;  %548 = vst [vmem:[%s3133_s5 + $0x548] sm:$0xff] %v547_v41  ;;  %v551_v43 = vld [vmem:[%s3128_s29 + $0x1298] sm:$0xff]  ;;  %v553_v44 = vld [vmem:[%s3128_s29 + $0x12c0] sm:$0xff] }
  0x7f   : > { %550 = vst [vmem:[%s3133_s5 + $0x550] sm:$0xff] %v549_v42  ;;  %v555_v45 = vld [vmem:[%s3128_s29 + $0x12c8] sm:$0xff]  ;;  %552 = vst [vmem:[%s3133_s5 + $0x558] sm:$0xff] %v551_v43  ;;  %v557_v46 = vld [vmem:[%s3128_s29 + $0x12d0] sm:$0xff] }
  0x80   : > { %554 = vst [vmem:[%s3133_s5 + $0x560] sm:$0xff] %v553_v44  ;;  %556 = vst [vmem:[%s3133_s5 + $0x568] sm:$0xff] %v555_v45  ;;  %v559_v47 = vld [vmem:[%s3128_s29 + $0x12d8] sm:$0xff]  ;;  %v561_v48 = vld [vmem:[%s3128_s29 + $0x1300] sm:$0xff] }
  0x81   : > { %558 = vst [vmem:[%s3133_s5 + $0x570] sm:$0xff] %v557_v46  ;;  %560 = vst [vmem:[%s3133_s5 + $0x578] sm:$0xff] %v559_v47  ;;  %v563_v49 = vld [vmem:[%s3128_s29 + $0x1308] sm:$0xff]  ;;  %v565_v50 = vld [vmem:[%s3128_s29 + $0x1310] sm:$0xff] }
  0x82   : > { %562 = vst [vmem:[%s3133_s5 + $0x580] sm:$0xff] %v561_v48  ;;  %v567_v51 = vld [vmem:[%s3128_s29 + $0x1318] sm:$0xff]  ;;  %564 = vst [vmem:[%s3133_s5 + $0x588] sm:$0xff] %v563_v49  ;;  %v569_v52 = vld [vmem:[%s3128_s29 + $0x1340] sm:$0xff] }
  0x83   : > { %566 = vst [vmem:[%s3133_s5 + $0x590] sm:$0xff] %v565_v50  ;;  %568 = vst [vmem:[%s3133_s5 + $0x598] sm:$0xff] %v567_v51  ;;  %v571_v53 = vld [vmem:[%s3128_s29 + $0x1348] sm:$0xff]  ;;  %v573_v54 = vld [vmem:[%s3128_s29 + $0x1350] sm:$0xff] }
  0x84   : > { %570 = vst [vmem:[%s3133_s5 + $0x5a0] sm:$0xff] %v569_v52  ;;  %572 = vst [vmem:[%s3133_s5 + $0x5a8] sm:$0xff] %v571_v53  ;;  %v575_v55 = vld [vmem:[%s3128_s29 + $0x1358] sm:$0xff]  ;;  %v577_v56 = vld [vmem:[%s3128_s29 + $0x1380] sm:$0xff] }
  0x85   : > { %574 = vst [vmem:[%s3133_s5 + $0x5b0] sm:$0xff] %v573_v54  ;;  %v579_v57 = vld [vmem:[%s3128_s29 + $0x1388] sm:$0xff]  ;;  %576 = vst [vmem:[%s3133_s5 + $0x5b8] sm:$0xff] %v575_v55  ;;  %v581_v58 = vld [vmem:[%s3128_s29 + $0x1390] sm:$0xff] }
  0x86   : > { %578 = vst [vmem:[%s3133_s5 + $0x5c0] sm:$0xff] %v577_v56  ;;  %580 = vst [vmem:[%s3133_s5 + $0x5c8] sm:$0xff] %v579_v57  ;;  %v583_v59 = vld [vmem:[%s3128_s29 + $0x1398] sm:$0xff]  ;;  %v585_v60 = vld [vmem:[%s3128_s29 + $0x13c0] sm:$0xff] }
  0x87   : > { %582 = vst [vmem:[%s3133_s5 + $0x5d0] sm:$0xff] %v581_v58  ;;  %584 = vst [vmem:[%s3133_s5 + $0x5d8] sm:$0xff] %v583_v59  ;;  %v587_v61 = vld [vmem:[%s3128_s29 + $0x13c8] sm:$0xff]  ;;  %v589_v62 = vld [vmem:[%s3128_s29 + $0x13d0] sm:$0xff] }
  0x88   : > { %586 = vst [vmem:[%s3133_s5 + $0x5e0] sm:$0xff] %v585_v60  ;;  %v591_v63 = vld [vmem:[%s3128_s29 + $0x13d8] sm:$0xff]  ;;  %588 = vst [vmem:[%s3133_s5 + $0x5e8] sm:$0xff] %v587_v61  ;;  %v593_v0 = vld [vmem:[%s3128_s29 + $0x1800] sm:$0xff] }
  0x89   : > { %590 = vst [vmem:[%s3133_s5 + $0x5f0] sm:$0xff] %v589_v62  ;;  %592 = vst [vmem:[%s3133_s5 + $0x5f8] sm:$0xff] %v591_v63  ;;  %v595_v1 = vld [vmem:[%s3128_s29 + $0x1808] sm:$0xff]  ;;  %v597_v2 = vld [vmem:[%s3128_s29 + $0x1810] sm:$0xff] }
  0x8a   : > { %594 = vst [vmem:[%s3133_s5 + $0x600] sm:$0xff] %v593_v0  ;;  %596 = vst [vmem:[%s3133_s5 + $0x608] sm:$0xff] %v595_v1  ;;  %v599_v3 = vld [vmem:[%s3128_s29 + $0x1818] sm:$0xff]  ;;  %v601_v4 = vld [vmem:[%s3128_s29 + $0x1840] sm:$0xff] }
  0x8b   : > { %598 = vst [vmem:[%s3133_s5 + $0x610] sm:$0xff] %v597_v2  ;;  %v603_v5 = vld [vmem:[%s3128_s29 + $0x1848] sm:$0xff]  ;;  %600 = vst [vmem:[%s3133_s5 + $0x618] sm:$0xff] %v599_v3  ;;  %v605_v6 = vld [vmem:[%s3128_s29 + $0x1850] sm:$0xff] }
  0x8c   : > { %602 = vst [vmem:[%s3133_s5 + $0x620] sm:$0xff] %v601_v4  ;;  %604 = vst [vmem:[%s3133_s5 + $0x628] sm:$0xff] %v603_v5  ;;  %v607_v7 = vld [vmem:[%s3128_s29 + $0x1858] sm:$0xff]  ;;  %v609_v8 = vld [vmem:[%s3128_s29 + $0x1880] sm:$0xff] }
  0x8d   : > { %606 = vst [vmem:[%s3133_s5 + $0x630] sm:$0xff] %v605_v6  ;;  %608 = vst [vmem:[%s3133_s5 + $0x638] sm:$0xff] %v607_v7  ;;  %v611_v9 = vld [vmem:[%s3128_s29 + $0x1888] sm:$0xff]  ;;  %v613_v10 = vld [vmem:[%s3128_s29 + $0x1890] sm:$0xff] }
  0x8e   : > { %610 = vst [vmem:[%s3133_s5 + $0x640] sm:$0xff] %v609_v8  ;;  %v615_v11 = vld [vmem:[%s3128_s29 + $0x1898] sm:$0xff]  ;;  %612 = vst [vmem:[%s3133_s5 + $0x648] sm:$0xff] %v611_v9  ;;  %v617_v12 = vld [vmem:[%s3128_s29 + $0x18c0] sm:$0xff] }
  0x8f   : > { %614 = vst [vmem:[%s3133_s5 + $0x650] sm:$0xff] %v613_v10  ;;  %616 = vst [vmem:[%s3133_s5 + $0x658] sm:$0xff] %v615_v11  ;;  %v619_v13 = vld [vmem:[%s3128_s29 + $0x18c8] sm:$0xff]  ;;  %v621_v14 = vld [vmem:[%s3128_s29 + $0x18d0] sm:$0xff] }
  0x90   : > { %618 = vst [vmem:[%s3133_s5 + $0x660] sm:$0xff] %v617_v12  ;;  %620 = vst [vmem:[%s3133_s5 + $0x668] sm:$0xff] %v619_v13  ;;  %v623_v15 = vld [vmem:[%s3128_s29 + $0x18d8] sm:$0xff]  ;;  %v625_v16 = vld [vmem:[%s3128_s29 + $0x1900] sm:$0xff] }
  0x91   : > { %622 = vst [vmem:[%s3133_s5 + $0x670] sm:$0xff] %v621_v14  ;;  %v627_v17 = vld [vmem:[%s3128_s29 + $0x1908] sm:$0xff]  ;;  %624 = vst [vmem:[%s3133_s5 + $0x678] sm:$0xff] %v623_v15  ;;  %v629_v18 = vld [vmem:[%s3128_s29 + $0x1910] sm:$0xff] }
  0x92   : > { %626 = vst [vmem:[%s3133_s5 + $0x680] sm:$0xff] %v625_v16  ;;  %628 = vst [vmem:[%s3133_s5 + $0x688] sm:$0xff] %v627_v17  ;;  %v631_v19 = vld [vmem:[%s3128_s29 + $0x1918] sm:$0xff]  ;;  %v633_v20 = vld [vmem:[%s3128_s29 + $0x1940] sm:$0xff] }
  0x93   : > { %630 = vst [vmem:[%s3133_s5 + $0x690] sm:$0xff] %v629_v18  ;;  %632 = vst [vmem:[%s3133_s5 + $0x698] sm:$0xff] %v631_v19  ;;  %v635_v21 = vld [vmem:[%s3128_s29 + $0x1948] sm:$0xff]  ;;  %v637_v22 = vld [vmem:[%s3128_s29 + $0x1950] sm:$0xff] }
  0x94   : > { %634 = vst [vmem:[%s3133_s5 + $0x6a0] sm:$0xff] %v633_v20  ;;  %v639_v23 = vld [vmem:[%s3128_s29 + $0x1958] sm:$0xff]  ;;  %636 = vst [vmem:[%s3133_s5 + $0x6a8] sm:$0xff] %v635_v21  ;;  %v641_v24 = vld [vmem:[%s3128_s29 + $0x1980] sm:$0xff] }
  0x95   : > { %638 = vst [vmem:[%s3133_s5 + $0x6b0] sm:$0xff] %v637_v22  ;;  %640 = vst [vmem:[%s3133_s5 + $0x6b8] sm:$0xff] %v639_v23  ;;  %v643_v25 = vld [vmem:[%s3128_s29 + $0x1988] sm:$0xff]  ;;  %v645_v26 = vld [vmem:[%s3128_s29 + $0x1990] sm:$0xff] }
  0x96   : > { %642 = vst [vmem:[%s3133_s5 + $0x6c0] sm:$0xff] %v641_v24  ;;  %644 = vst [vmem:[%s3133_s5 + $0x6c8] sm:$0xff] %v643_v25  ;;  %v647_v27 = vld [vmem:[%s3128_s29 + $0x1998] sm:$0xff]  ;;  %v649_v28 = vld [vmem:[%s3128_s29 + $0x19c0] sm:$0xff] }
  0x97   : > { %646 = vst [vmem:[%s3133_s5 + $0x6d0] sm:$0xff] %v645_v26  ;;  %v651_v29 = vld [vmem:[%s3128_s29 + $0x19c8] sm:$0xff]  ;;  %648 = vst [vmem:[%s3133_s5 + $0x6d8] sm:$0xff] %v647_v27  ;;  %v653_v30 = vld [vmem:[%s3128_s29 + $0x19d0] sm:$0xff] }
  0x98   : > { %650 = vst [vmem:[%s3133_s5 + $0x6e0] sm:$0xff] %v649_v28  ;;  %652 = vst [vmem:[%s3133_s5 + $0x6e8] sm:$0xff] %v651_v29  ;;  %v655_v31 = vld [vmem:[%s3128_s29 + $0x19d8] sm:$0xff]  ;;  %v657_v32 = vld [vmem:[%s3128_s29 + $0x1a00] sm:$0xff] }
  0x99   : > { %654 = vst [vmem:[%s3133_s5 + $0x6f0] sm:$0xff] %v653_v30  ;;  %656 = vst [vmem:[%s3133_s5 + $0x6f8] sm:$0xff] %v655_v31  ;;  %v659_v33 = vld [vmem:[%s3128_s29 + $0x1a08] sm:$0xff]  ;;  %v661_v34 = vld [vmem:[%s3128_s29 + $0x1a10] sm:$0xff] }
  0x9a   : > { %658 = vst [vmem:[%s3133_s5 + $0x700] sm:$0xff] %v657_v32  ;;  %v663_v35 = vld [vmem:[%s3128_s29 + $0x1a18] sm:$0xff]  ;;  %660 = vst [vmem:[%s3133_s5 + $0x708] sm:$0xff] %v659_v33  ;;  %v665_v36 = vld [vmem:[%s3128_s29 + $0x1a40] sm:$0xff] }
  0x9b   : > { %662 = vst [vmem:[%s3133_s5 + $0x710] sm:$0xff] %v661_v34  ;;  %664 = vst [vmem:[%s3133_s5 + $0x718] sm:$0xff] %v663_v35  ;;  %v667_v37 = vld [vmem:[%s3128_s29 + $0x1a48] sm:$0xff]  ;;  %v669_v38 = vld [vmem:[%s3128_s29 + $0x1a50] sm:$0xff] }
  0x9c   : > { %666 = vst [vmem:[%s3133_s5 + $0x720] sm:$0xff] %v665_v36  ;;  %668 = vst [vmem:[%s3133_s5 + $0x728] sm:$0xff] %v667_v37  ;;  %v671_v39 = vld [vmem:[%s3128_s29 + $0x1a58] sm:$0xff]  ;;  %v673_v40 = vld [vmem:[%s3128_s29 + $0x1a80] sm:$0xff] }
  0x9d   : > { %670 = vst [vmem:[%s3133_s5 + $0x730] sm:$0xff] %v669_v38  ;;  %v675_v41 = vld [vmem:[%s3128_s29 + $0x1a88] sm:$0xff]  ;;  %672 = vst [vmem:[%s3133_s5 + $0x738] sm:$0xff] %v671_v39  ;;  %v677_v42 = vld [vmem:[%s3128_s29 + $0x1a90] sm:$0xff] }
  0x9e   : > { %674 = vst [vmem:[%s3133_s5 + $0x740] sm:$0xff] %v673_v40  ;;  %676 = vst [vmem:[%s3133_s5 + $0x748] sm:$0xff] %v675_v41  ;;  %v679_v43 = vld [vmem:[%s3128_s29 + $0x1a98] sm:$0xff]  ;;  %v681_v44 = vld [vmem:[%s3128_s29 + $0x1ac0] sm:$0xff] }
  0x9f   : > { %678 = vst [vmem:[%s3133_s5 + $0x750] sm:$0xff] %v677_v42  ;;  %680 = vst [vmem:[%s3133_s5 + $0x758] sm:$0xff] %v679_v43  ;;  %v683_v45 = vld [vmem:[%s3128_s29 + $0x1ac8] sm:$0xff]  ;;  %v685_v46 = vld [vmem:[%s3128_s29 + $0x1ad0] sm:$0xff] }
  0xa0   : > { %682 = vst [vmem:[%s3133_s5 + $0x760] sm:$0xff] %v681_v44  ;;  %v687_v47 = vld [vmem:[%s3128_s29 + $0x1ad8] sm:$0xff]  ;;  %684 = vst [vmem:[%s3133_s5 + $0x768] sm:$0xff] %v683_v45  ;;  %v689_v48 = vld [vmem:[%s3128_s29 + $0x1b00] sm:$0xff] }
  0xa1   : > { %686 = vst [vmem:[%s3133_s5 + $0x770] sm:$0xff] %v685_v46  ;;  %688 = vst [vmem:[%s3133_s5 + $0x778] sm:$0xff] %v687_v47  ;;  %v691_v49 = vld [vmem:[%s3128_s29 + $0x1b08] sm:$0xff]  ;;  %v693_v50 = vld [vmem:[%s3128_s29 + $0x1b10] sm:$0xff] }
  0xa2   : > { %690 = vst [vmem:[%s3133_s5 + $0x780] sm:$0xff] %v689_v48  ;;  %692 = vst [vmem:[%s3133_s5 + $0x788] sm:$0xff] %v691_v49  ;;  %v695_v51 = vld [vmem:[%s3128_s29 + $0x1b18] sm:$0xff]  ;;  %v697_v52 = vld [vmem:[%s3128_s29 + $0x1b40] sm:$0xff] }
  0xa3   : > { %694 = vst [vmem:[%s3133_s5 + $0x790] sm:$0xff] %v693_v50  ;;  %v699_v53 = vld [vmem:[%s3128_s29 + $0x1b48] sm:$0xff]  ;;  %696 = vst [vmem:[%s3133_s5 + $0x798] sm:$0xff] %v695_v51  ;;  %v701_v54 = vld [vmem:[%s3128_s29 + $0x1b50] sm:$0xff] }
  0xa4   : > { %698 = vst [vmem:[%s3133_s5 + $0x7a0] sm:$0xff] %v697_v52  ;;  %700 = vst [vmem:[%s3133_s5 + $0x7a8] sm:$0xff] %v699_v53  ;;  %v703_v55 = vld [vmem:[%s3128_s29 + $0x1b58] sm:$0xff]  ;;  %v705_v56 = vld [vmem:[%s3128_s29 + $0x1b80] sm:$0xff] }
  0xa5   : > { %702 = vst [vmem:[%s3133_s5 + $0x7b0] sm:$0xff] %v701_v54  ;;  %704 = vst [vmem:[%s3133_s5 + $0x7b8] sm:$0xff] %v703_v55  ;;  %v707_v57 = vld [vmem:[%s3128_s29 + $0x1b88] sm:$0xff]  ;;  %v709_v58 = vld [vmem:[%s3128_s29 + $0x1b90] sm:$0xff] }
  0xa6   : > { %706 = vst [vmem:[%s3133_s5 + $0x7c0] sm:$0xff] %v705_v56  ;;  %v711_v59 = vld [vmem:[%s3128_s29 + $0x1b98] sm:$0xff]  ;;  %708 = vst [vmem:[%s3133_s5 + $0x7c8] sm:$0xff] %v707_v57  ;;  %v713_v60 = vld [vmem:[%s3128_s29 + $0x1bc0] sm:$0xff] }
  0xa7   : > { %710 = vst [vmem:[%s3133_s5 + $0x7d0] sm:$0xff] %v709_v58  ;;  %712 = vst [vmem:[%s3133_s5 + $0x7d8] sm:$0xff] %v711_v59  ;;  %v715_v61 = vld [vmem:[%s3128_s29 + $0x1bc8] sm:$0xff]  ;;  %v717_v62 = vld [vmem:[%s3128_s29 + $0x1bd0] sm:$0xff] }
  0xa8   : > { %714 = vst [vmem:[%s3133_s5 + $0x7e0] sm:$0xff] %v713_v60  ;;  %716 = vst [vmem:[%s3133_s5 + $0x7e8] sm:$0xff] %v715_v61  ;;  %v719_v63 = vld [vmem:[%s3128_s29 + $0x1bd8] sm:$0xff] }
  0xa9   : > { %718 = vst [vmem:[%s3133_s5 + $0x7f0] sm:$0xff] %v717_v62  ;;  %720 = vst [vmem:[%s3133_s5 + $0x7f8] sm:$0xff] %v719_v63 }
  0xaa PF: > { %p2186_p0 = scmp.ge.s32.totalorder %s2998_s24, 1  ;;  %p733_p1 = scmp.lt.s32.totalorder %s2998_s24, 5 }
  0xac   : > { %p734_p2 = pnand %p2186_p0, %p733_p1 }
  0xad   : > { %s740_s13 = sand.u32 (!%p734_p2), 1, %s2974_s18   ;;  %s4171_s14 = sand.u32 (!%p734_p2), 1, %s2966_s16  }
  0xae   : > { %737 = sbr.rel (%p734_p2) target bundleno = 1317 (0x525), region = 55  ;;  %s2187_s25 = sshll.u32 (!%p734_p2), %s740_s13, 11 }
  0xaf   : > { %s3650_s26 = sshll.u32 (!%p734_p2), %s4171_s14, 3  ;;  %s2189_s30 = sshll.u32 (!%p734_p2), %s2982_s20, 4 }
  0xb0   : > { %s2192_s8 = sshll.u32 (!%p734_p2), %s2986_s21, 2  ;;  %p776_p3 = scmp.lt.s32.totalorder (!%p734_p2), %s2189_s30, 31 }
  0xb1   : > { %p785_p4 = scmp.lt.s32.totalorder (!%p734_p2), %s2192_s8, 7  ;;  %s3665_s2 = scalar_lea.vmem (!%p734_p2), [#allocation3], %s2187_s25 }
  0xb2   : > { %s774_s28 = scalar_lea.vmem (!%p734_p2), [#allocation4], %s3650_s26  ;;  %p2193_p5 = scmp.ne.s32.totalorder (!%p734_p2), %s2982_s20, 0 }
  0xb5   : > { %s4197_s30 = smov (!%p776_p3, %s2189_s30), 31  ;;  %s4199_s8 = smov (!%p785_p4, %s2192_s8), 7 }
  0xb6   : > { %s2400_s9 = sshll.u32 %s4197_s30, 4  ;;  %s787_s14 = scalar_lea.vmem %s4169_s3, %s4199_s8  ;;  %v3000_v0 = vmov (!%p2193_p5), 0.0  }
  0xb7   : > { %s3659_s5 = scalar_lea.vmem %s4166_s0, %s2400_s9  ;;  %793 = sbr.rel (%p2193_p5) target bundleno = 190 (0xbe), region = 63  ;;  %794 = vst [vmem:[#allocation2] sm:$0xff] (!%p2193_p5), %v3000_v0 }
  0xbe PF: > { %v796_v1 = vld [vmem:[%s3659_s5 + $0x8] sm:$0xff]  ;;  %v798_v2 = vld [vmem:[%s3659_s5 + $0x18] sm:$0xff]  ;;  %v795_v3 = vld [vmem:[%s3659_s5] sm:$0xff]  ;;  %p2393_p6 = scmp.ne.s32.totalorder %s2982_s20, 1 }
  0xbf   : > { %v3672_v4 = vpack.c.bf16 %v798_v2, %v796_v1  ;;  %v797_v5 = vld [vmem:[%s3659_s5 + $0x10] sm:$0xff]  ;;  %v800_v6 = vld [vmem:[%s3659_s5 + $0x28] sm:$0xff]  ;;  %v802_v7 = vld [vmem:[%s3659_s5 + $0x38] sm:$0xff] }
  0xc0   : > { %v3677_v8 = vpack.c.bf16 %v797_v5, %v795_v3  ;;  %v3679_v9 = vpack.c.bf16 %v802_v7, %v800_v6  ;;  %v799_v10 = vld [vmem:[%s3659_s5 + $0x20] sm:$0xff]  ;;  %v801_v11 = vld [vmem:[%s3659_s5 + $0x30] sm:$0xff]  ;;  %v804_v12 = vld [vmem:[%s3659_s5 + $0x48] sm:$0xff] }
  0xc1   : > { %2435 = vmatprep.subr.bf16.mxu1 %v3672_v4  ;;  %2403 = vmatprep.subr.bf16.mxu0 %v3672_v4  ;;  %v806_v13 = vld [vmem:[%s3659_s5 + $0x58] sm:$0xff]  ;;  %v3691_v14 = vpack.c.bf16 %v801_v11, %v799_v10  ;;  %v3698_v16 = vld.sshfl [vmem:[%s4167_s1 + $0x4] sm:$0x33 pattern:$0x76325410]  ;;  %v805_v21 = vld [vmem:[%s3659_s5 + $0x50] sm:$0xff] }
  0xc2   : > { %2437 = vmatpush1.bf16.xpose.msra.mxu1 %v3677_v8  ;;  %2405 = vmatpush1.bf16.xpose.msra.mxu0 %v3677_v8  ;;  %v3693_v15 = vpack.c.bf16 %v806_v13, %v804_v12  ;;  %v983_v17 = vcombine.high %v3698_v16, %v3698_v16  ;;  %v3705_v18 = vld.sshfl [vmem:[%s4167_s1] sm:$0x33 pattern:$0x76325410]  ;;  %v808_v22 = vld [vmem:[%s3659_s5 + $0x68] sm:$0xff]  ;;  %v810_v23 = vld [vmem:[%s3659_s5 + $0x78] sm:$0xff] }
  0xc3   : > { %2439 = vmatprep.subr.bf16.mxu1 %v3679_v9  ;;  %2407 = vmatprep.subr.bf16.mxu0 %v3679_v9  ;;  %v836_v19 = vcombine.high %v3705_v18, %v3705_v18  ;;  %v803_v20 = vld [vmem:[%s3659_s5 + $0x40] sm:$0xff]  ;;  %v3719_v25 = vpack.c.bf16 %v810_v23, %v808_v22  ;;  %v809_v27 = vld [vmem:[%s3659_s5 + $0x70] sm:$0xff]  ;;  %v812_v28 = vld [vmem:[%s3659_s5 + $0x88] sm:$0xff] }
  0xc4   : > { %1050 = vmatprep.mubr.f32.mxu1 %v983_v17  ;;  %v3717_v24 = vpack.c.bf16 %v805_v21, %v803_v20  ;;  %v807_v26 = vld [vmem:[%s3659_s5 + $0x60] sm:$0xff]  ;;  %v814_v29 = vld [vmem:[%s3659_s5 + $0x98] sm:$0xff]  ;;  %v813_v33 = vld [vmem:[%s3659_s5 + $0x90] sm:$0xff] }
  0xc5   : > { %903 = vmatprep.mubr.f32.mxu0 %v836_v19  ;;  %v3729_v30 = vpack.c.bf16 %v809_v27, %v807_v26  ;;  %v3731_v31 = vpack.c.bf16 %v814_v29, %v812_v28  ;;  %v811_v32 = vld [vmem:[%s3659_s5 + $0x80] sm:$0xff]  ;;  %v816_v34 = vld [vmem:[%s3659_s5 + $0xa8] sm:$0xff]  ;;  %v818_v35 = vld [vmem:[%s3659_s5 + $0xb8] sm:$0xff] }
  0xc6   : > { %v3741_v36 = vpack.c.bf16 %v813_v33, %v811_v32  ;;  %v3743_v37 = vpack.c.bf16 %v818_v35, %v816_v34  ;;  %v815_v38 = vld [vmem:[%s3659_s5 + $0xa0] sm:$0xff]  ;;  %v817_v39 = vld [vmem:[%s3659_s5 + $0xb0] sm:$0xff]  ;;  %v820_v40 = vld [vmem:[%s3659_s5 + $0xc8] sm:$0xff] }
  0xc7   : > { %v822_v41 = vld [vmem:[%s3659_s5 + $0xd8] sm:$0xff]  ;;  %v3753_v42 = vpack.c.bf16 %v817_v39, %v815_v38  ;;  %v819_v44 = vld [vmem:[%s3659_s5 + $0xc0] sm:$0xff]  ;;  %v821_v45 = vld [vmem:[%s3659_s5 + $0xd0] sm:$0xff] }
  0xc8   : > { %v3755_v43 = vpack.c.bf16 %v822_v41, %v820_v40  ;;  %v824_v46 = vld [vmem:[%s3659_s5 + $0xe8] sm:$0xff]  ;;  %v826_v47 = vld [vmem:[%s3659_s5 + $0xf8] sm:$0xff]  ;;  %v3765_v48 = vpack.c.bf16 %v821_v45, %v819_v44  ;;  %v823_v50 = vld [vmem:[%s3659_s5 + $0xe0] sm:$0xff] }
  0xc9   : > { %v3767_v49 = vpack.c.bf16 %v826_v47, %v824_v46  ;;  %v825_v51 = vld [vmem:[%s3659_s5 + $0xf0] sm:$0xff]  ;;  %v2200_v54 = vld [vmem:[%s3665_s2 + $0x218] sm:$0xff]  ;;  %v2197_v59 = vld [vmem:[%s3665_s2 + $0x200] sm:$0xff] }
  0xca   : > { %2441 = vmatpush1.bf16.xpose.msra.mxu1 %v3691_v14  ;;  %2409 = vmatpush1.bf16.xpose.msra.mxu0 %v3691_v14  ;;  %v2198_v52 = vld [vmem:[%s3665_s2 + $0x208] sm:$0xff]  ;;  %v2204_v55 = vld [vmem:[%s3665_s2 + $0x238] sm:$0xff]  ;;  %v3779_v56 = vpack.c.bf16 %v825_v51, %v823_v50  ;;  %v2201_v60 = vld [vmem:[%s3665_s2 + $0x220] sm:$0xff] }
  0xcb   : > { %2443 = vmatprep.subr.bf16.mxu1 %v3693_v15  ;;  %2411 = vmatprep.subr.bf16.mxu0 %v3693_v15  ;;  %v2202_v53 = vld [vmem:[%s3665_s2 + $0x228] sm:$0xff]  ;;  %v2498_v58 = vpack.c.bf16 %v2204_v55, %v2200_v54  ;;  %v2199_v61 = vld [vmem:[%s3665_s2 + $0x210] sm:$0xff]  ;;  %v2208_v1 = vld [vmem:[%s3665_s2 + $0x258] sm:$0xff]  ;;  %v2468_v3 = vpack.c.bf16 %v2201_v60, %v2197_v59 }
  0xcc   : > { %v2466_v57 = vpack.c.bf16 %v2202_v53, %v2198_v52  ;;  %v2203_v62 = vld [vmem:[%s3665_s2 + $0x230] sm:$0xff]  ;;  %v2206_v63 = vld [vmem:[%s3665_s2 + $0x248] sm:$0xff]  ;;  %v2212_v2 = vld [vmem:[%s3665_s2 + $0x278] sm:$0xff] }
  0xcd   : > { %v2210_v0 = vld [vmem:[%s3665_s2 + $0x268] sm:$0xff]  ;;  %v2500_v5 = vpack.c.bf16 %v2203_v62, %v2199_v61  ;;  %v2205_v6 = vld [vmem:[%s3665_s2 + $0x240] sm:$0xff]  ;;  %v2502_v11 = vpack.c.bf16 %v2212_v2, %v2208_v1  ;;  %v2207_v12 = vld [vmem:[%s3665_s2 + $0x250] sm:$0xff] }
  0xce   : > { %v2209_v7 = vld [vmem:[%s3665_s2 + $0x260] sm:$0xff]  ;;  %v2470_v10 = vpack.c.bf16 %v2210_v0, %v2206_v63  ;;  %v2211_v13 = vld [vmem:[%s3665_s2 + $0x270] sm:$0xff]  ;;  %v2214_v17 = vld [vmem:[%s3665_s2 + $0x288] sm:$0xff] }
  0xcf   : > { %v2218_v19 = vld [vmem:[%s3665_s2 + $0x2a8] sm:$0xff]  ;;  %v2216_v20 = vld [vmem:[%s3665_s2 + $0x298] sm:$0xff]  ;;  %v2472_v22 = vpack.c.bf16 %v2209_v7, %v2205_v6  ;;  %v2504_v23 = vpack.c.bf16 %v2211_v13, %v2207_v12  ;;  %v2213_v26 = vld [vmem:[%s3665_s2 + $0x280] sm:$0xff] }
  0xd0   : > { %v2220_v21 = vld [vmem:[%s3665_s2 + $0x2b8] sm:$0xff]  ;;  %v2217_v27 = vld [vmem:[%s3665_s2 + $0x2a0] sm:$0xff]  ;;  %v2474_v28 = vpack.c.bf16 %v2218_v19, %v2214_v17  ;;  %v2215_v32 = vld [vmem:[%s3665_s2 + $0x290] sm:$0xff] }
  0xd1   : > { %v2506_v29 = vpack.c.bf16 %v2220_v21, %v2216_v20  ;;  %v2219_v33 = vld [vmem:[%s3665_s2 + $0x2b0] sm:$0xff]  ;;  %v2224_v34 = vld [vmem:[%s3665_s2 + $0x2d8] sm:$0xff]  ;;  %v2476_v38 = vpack.c.bf16 %v2217_v27, %v2213_v26  ;;  %v2221_v40 = vld [vmem:[%s3665_s2 + $0x2c0] sm:$0xff] }
  0xd2   : > { %2445 = vmatpush1.bf16.xpose.msra.mxu1 %v3717_v24  ;;  %2413 = vmatpush1.bf16.xpose.msra.mxu0 %v3717_v24  ;;  %v2228_v35 = vld [vmem:[%s3665_s2 + $0x2f8] sm:$0xff]  ;;  %v2508_v39 = vpack.c.bf16 %v2219_v33, %v2215_v32  ;;  %v2225_v41 = vld [vmem:[%s3665_s2 + $0x2e0] sm:$0xff]  ;;  %v2223_v46 = vld [vmem:[%s3665_s2 + $0x2d0] sm:$0xff] }
  0xd3   : > { %2447 = vmatprep.subr.bf16.mxu1 %v3719_v25  ;;  %2415 = vmatprep.subr.bf16.mxu0 %v3719_v25  ;;  %v2510_v45 = vpack.c.bf16 %v2228_v35, %v2224_v34  ;;  %v2227_v47 = vld [vmem:[%s3665_s2 + $0x2f0] sm:$0xff]  ;;  %v2230_v50 = vld [vmem:[%s3665_s2 + $0x308] sm:$0xff]  ;;  %v2232_v52 = vld [vmem:[%s3665_s2 + $0x318] sm:$0xff]  ;;  %v2480_v54 = vpack.c.bf16 %v2225_v41, %v2221_v40 }
  0xd4   : > { %v2234_v51 = vld [vmem:[%s3665_s2 + $0x328] sm:$0xff]  ;;  %v2236_v53 = vld [vmem:[%s3665_s2 + $0x338] sm:$0xff]  ;;  %v2512_v55 = vpack.c.bf16 %v2227_v47, %v2223_v46  ;;  %v2231_v61 = vld [vmem:[%s3665_s2 + $0x310] sm:$0xff] }
  0xd5   : > { %v2482_v59 = vpack.c.bf16 %v2234_v51, %v2230_v50  ;;  %v2514_v60 = vpack.c.bf16 %v2236_v53, %v2232_v52  ;;  %v2235_v62 = vld [vmem:[%s3665_s2 + $0x330] sm:$0xff]  ;;  %v2238_v63 = vld [vmem:[%s3665_s2 + $0x348] sm:$0xff]  ;;  %v2240_v1 = vld [vmem:[%s3665_s2 + $0x358] sm:$0xff] }
  0xd6   : > { %v2242_v0 = vld [vmem:[%s3665_s2 + $0x368] sm:$0xff]  ;;  %v2244_v2 = vld [vmem:[%s3665_s2 + $0x378] sm:$0xff]  ;;  %v2237_v6 = vld [vmem:[%s3665_s2 + $0x340] sm:$0xff] }
  0xd7   : > { %v2241_v7 = vld [vmem:[%s3665_s2 + $0x360] sm:$0xff]  ;;  %v2239_v12 = vld [vmem:[%s3665_s2 + $0x350] sm:$0xff]  ;;  %v2246_v17 = vld [vmem:[%s3665_s2 + $0x388] sm:$0xff] }
  0xd8   : > { %v2243_v13 = vld [vmem:[%s3665_s2 + $0x370] sm:$0xff]  ;;  %v2250_v19 = vld [vmem:[%s3665_s2 + $0x3a8] sm:$0xff]  ;;  %v2248_v20 = vld [vmem:[%s3665_s2 + $0x398] sm:$0xff] }
  0xd9   : > { %v2252_v21 = vld [vmem:[%s3665_s2 + $0x3b8] sm:$0xff]  ;;  %v2245_v26 = vld [vmem:[%s3665_s2 + $0x380] sm:$0xff]  ;;  %v2247_v32 = vld [vmem:[%s3665_s2 + $0x390] sm:$0xff] }
  0xda   : > { %2449 = vmatpush1.bf16.xpose.msra.mxu1 %v3729_v30  ;;  %2417 = vmatpush1.bf16.xpose.msra.mxu0 %v3729_v30  ;;  %v2249_v27 = vld [vmem:[%s3665_s2 + $0x3a0] sm:$0xff]  ;;  %v2251_v33 = vld [vmem:[%s3665_s2 + $0x3b0] sm:$0xff]  ;;  %v2256_v34 = vld [vmem:[%s3665_s2 + $0x3d8] sm:$0xff] }
  0xdb   : > { %2451 = vmatprep.subr.bf16.mxu1 %v3731_v31  ;;  %2419 = vmatprep.subr.bf16.mxu0 %v3731_v31  ;;  %v2260_v35 = vld [vmem:[%s3665_s2 + $0x3f8] sm:$0xff]  ;;  %v2253_v40 = vld [vmem:[%s3665_s2 + $0x3c0] sm:$0xff]  ;;  %v2255_v46 = vld [vmem:[%s3665_s2 + $0x3d0] sm:$0xff] }
  0xdc   : > { %v2259_v47 = vld [vmem:[%s3665_s2 + $0x3f0] sm:$0xff]  ;;  %v910_v52 = vld [vmem:[%s3665_s2 + $0x8] sm:$0xff] }
  0xdd   : > { %v2528_v51 = vpack.c.bf16 %v2259_v47, %v2255_v46  ;;  %v914_v53 = vld [vmem:[%s3665_s2 + $0x28] sm:$0xff]  ;;  %v933_v46 = vld [vmem:[%s3665_s2 + $0xc0] sm:$0xff] }
  0xde   : > { %v937_v47 = vld [vmem:[%s3665_s2 + $0xe0] sm:$0xff] }
  0xe2   : > { %2453 = vmatpush1.bf16.xpose.msra.mxu1 %v3741_v36  ;;  %2421 = vmatpush1.bf16.xpose.msra.mxu0 %v3741_v36 }
  0xe3   : > { %2455 = vmatprep.subr.bf16.mxu1 %v3743_v37  ;;  %2423 = vmatprep.subr.bf16.mxu0 %v3743_v37 }
  0xea   : > { %2457 = vmatpush1.bf16.xpose.msra.mxu1 %v3753_v42  ;;  %2425 = vmatpush1.bf16.xpose.msra.mxu0 %v3753_v42 }
  0xeb   : > { %2459 = vmatprep.subr.bf16.mxu1 %v3755_v43  ;;  %2427 = vmatprep.subr.bf16.mxu0 %v3755_v43 }
  0xf2   : > { %2461 = vmatpush1.bf16.xpose.msra.mxu1 %v3765_v48  ;;  %2429 = vmatpush1.bf16.xpose.msra.mxu0 %v3765_v48 }
  0xf3   : > { %2463 = vmatprep.subr.bf16.mxu1 %v3767_v49  ;;  %2431 = vmatprep.subr.bf16.mxu0 %v3767_v49 }
  0xfa   : > { %2465 = vmatpush1.bf16.xpose.msra.mxu1 %v3779_v56  ;;  %2433 = vmatpush1.bf16.xpose.msra.mxu0 %v3779_v56 }
  0xfb   : > { %2467 = vmatprep.subr.bf16.mxu0 %v2466_v57  ;;  %2499 = vmatprep.subr.bf16.mxu1 %v2498_v58  ;;  %v2229_v57 = vld [vmem:[%s3665_s2 + $0x300] sm:$0xff] }
  0xfc   : > { %v2233_v58 = vld [vmem:[%s3665_s2 + $0x320] sm:$0xff] }
 0x101   : > { %1051 = vmatmul.mubr.f32.vlgmr.msra.gmra.mrb[0].mxu1 %v3698_v16  ;;  %904 = vmatmul.mubr.f32.vlgmr.msra.gmra.mrb[0].mxu0 %v3705_v18  ;;  %v2222_v16 = vld [vmem:[%s3665_s2 + $0x2c8] sm:$0xff] }
 0x102   : > { %2469 = vmatpush1.bf16.msra.mxu0 %v2468_v3  ;;  %2501 = vmatpush1.bf16.msra.mxu1 %v2500_v5  ;;  %v2226_v18 = vld [vmem:[%s3665_s2 + $0x2e8] sm:$0xff]  ;;  %v2484_v3 = vpack.c.bf16 %v2233_v58, %v2229_v57  ;;  %v2516_v5 = vpack.c.bf16 %v2235_v62, %v2231_v61  ;;  %v912_v57 = vld [vmem:[%s3665_s2 + $0x18] sm:$0xff]  ;;  %v913_v61 = vld [vmem:[%s3665_s2 + $0x20] sm:$0xff] }
 0x103   : > { %2471 = vmatprep.subr.bf16.mxu0 %v2470_v10  ;;  %2503 = vmatprep.subr.bf16.mxu1 %v2502_v11  ;;  %v2478_v44 = vpack.c.bf16 %v2226_v18, %v2222_v16  ;;  %v2486_v10 = vpack.c.bf16 %v2242_v0, %v2238_v63  ;;  %v2518_v11 = vpack.c.bf16 %v2244_v2, %v2240_v1  ;;  %v2254_v16 = vld [vmem:[%s3665_s2 + $0x3c8] sm:$0xff]  ;;  %v916_v58 = vld [vmem:[%s3665_s2 + $0x38] sm:$0xff]  ;;  %v911_v63 = vld [vmem:[%s3665_s2 + $0x10] sm:$0xff] }
 0x104   : > { %v2258_v18 = vld [vmem:[%s3665_s2 + $0x3e8] sm:$0xff]  ;;  %v915_v0 = vld [vmem:[%s3665_s2 + $0x30] sm:$0xff]  ;;  %v920_v2 = vld [vmem:[%s3665_s2 + $0x58] sm:$0xff] }
 0x105   : > { %v2494_v41 = vpack.c.bf16 %v2258_v18, %v2254_v16  ;;  %v918_v62 = vld [vmem:[%s3665_s2 + $0x48] sm:$0xff] }
 0x106   : > { %2473 = vmatpush1.bf16.msra.mxu0 %v2472_v22  ;;  %2505 = vmatpush1.bf16.msra.mxu1 %v2504_v23  ;;  %v2488_v22 = vpack.c.bf16 %v2241_v7, %v2237_v6  ;;  %v2520_v23 = vpack.c.bf16 %v2243_v13, %v2239_v12  ;;  %v922_v1 = vld [vmem:[%s3665_s2 + $0x68] sm:$0xff]  ;;  %v917_v6 = vld [vmem:[%s3665_s2 + $0x40] sm:$0xff] }
 0x107   : > { %2475 = vmatprep.subr.bf16.mxu0 %v2474_v28  ;;  %2507 = vmatprep.subr.bf16.mxu1 %v2506_v29  ;;  %v2490_v28 = vpack.c.bf16 %v2250_v19, %v2246_v17  ;;  %v2522_v29 = vpack.c.bf16 %v2252_v21, %v2248_v20  ;;  %v921_v7 = vld [vmem:[%s3665_s2 + $0x60] sm:$0xff]  ;;  %v926_v12 = vld [vmem:[%s3665_s2 + $0x88] sm:$0xff]  ;;  %v919_v17 = vld [vmem:[%s3665_s2 + $0x50] sm:$0xff] }
 0x108   : > { %v923_v19 = vld [vmem:[%s3665_s2 + $0x70] sm:$0xff]  ;;  %v930_v21 = vld [vmem:[%s3665_s2 + $0xa8] sm:$0xff] }
 0x109   : > { %v2568_v16 = vpack.c.bf16 %v923_v19, %v919_v17  ;;  %v2538_v18 = vpack.c.bf16 %v930_v21, %v926_v12  ;;  %v953_v17 = vld [vmem:[%s3665_s2 + $0x160] sm:$0xff]  ;;  %v958_v21 = vld [vmem:[%s3665_s2 + $0x188] sm:$0xff] }
 0x10a   : > { %2477 = vmatpush1.bf16.msra.mxu0 %v2476_v38  ;;  %2509 = vmatpush1.bf16.msra.mxu1 %v2508_v39  ;;  %v2492_v38 = vpack.c.bf16 %v2249_v27, %v2245_v26  ;;  %v2524_v39 = vpack.c.bf16 %v2251_v33, %v2247_v32  ;;  %v925_v32 = vld [vmem:[%s3665_s2 + $0x80] sm:$0xff] }
 0x10b   : > { %2479 = vmatprep.subr.bf16.mxu0 %v2478_v44  ;;  %2511 = vmatprep.subr.bf16.mxu1 %v2510_v45  ;;  %v2257_v44 = vld [vmem:[%s3665_s2 + $0x3e0] sm:$0xff]  ;;  %v2526_v45 = vpack.c.bf16 %v2260_v35, %v2256_v34  ;;  %v934_v34 = vld [vmem:[%s3665_s2 + $0xc8] sm:$0xff] }
 0x10c   : > { %v2496_v50 = vpack.c.bf16 %v2257_v44, %v2253_v40  ;;  %v929_v33 = vld [vmem:[%s3665_s2 + $0xa0] sm:$0xff]  ;;  %v938_v40 = vld [vmem:[%s3665_s2 + $0xe8] sm:$0xff]  ;;  %v940_v44 = vld [vmem:[%s3665_s2 + $0xf8] sm:$0xff] }
 0x10e   : > { %2481 = vmatpush1.bf16.msra.mxu0 %v2480_v54  ;;  %2513 = vmatpush1.bf16.msra.mxu1 %v2512_v55  ;;  %v2530_v54 = vpack.c.bf16 %v914_v53, %v910_v52  ;;  %v3001_v55 = vmov 0.0   ;;  %v942_v52 = vld [vmem:[%s3665_s2 + $0x108] sm:$0xff] }
 0x10f   : > { %2483 = vmatprep.subr.bf16.mxu0 %v2482_v59  ;;  %2515 = vmatprep.subr.bf16.mxu1 %v2514_v60  ;;  %v2562_v59 = vpack.c.bf16 %v916_v58, %v912_v57  ;;  %v909_v60 = vld [vmem:[%s3665_s2] sm:$0xff]  ;;  %v939_v57 = vld [vmem:[%s3665_s2 + $0xf0] sm:$0xff]  ;;  %v946_v58 = vld [vmem:[%s3665_s2 + $0x128] sm:$0xff] }
 0x110   : > { %1185 = vmatprep.mubr.f32.mxu0 %v3001_v55  ;;  %1256 = vmatprep.mubr.f32.mxu1 %v3001_v55 }
 0x112   : > { %2485 = vmatpush1.bf16.msra.mxu0 %v2484_v3  ;;  %2517 = vmatpush1.bf16.msra.mxu1 %v2516_v5  ;;  %v924_v3 = vld [vmem:[%s3665_s2 + $0x78] sm:$0xff]  ;;  %v2532_v5 = vpack.c.bf16 %v913_v61, %v909_v60  ;;  %v2544_v61 = vpack.c.bf16 %v937_v47, %v933_v46 }
 0x113   : > { %2487 = vmatprep.subr.bf16.mxu0 %v2486_v10  ;;  %2519 = vmatprep.subr.bf16.mxu1 %v2518_v11  ;;  %v2564_v10 = vpack.c.bf16 %v915_v0, %v911_v63  ;;  %v2534_v11 = vpack.c.bf16 %v922_v1, %v918_v62  ;;  %v2566_v13 = vpack.c.bf16 %v924_v3, %v920_v2  ;;  %v948_v60 = vld [vmem:[%s3665_s2 + $0x138] sm:$0xff]  ;;  %v941_v62 = vld [vmem:[%s3665_s2 + $0x100] sm:$0xff]  ;;  %v950_v2 = vld [vmem:[%s3665_s2 + $0x148] sm:$0xff] }
 0x114   : > { %v945_v63 = vld [vmem:[%s3665_s2 + $0x120] sm:$0xff]  ;;  %v2546_v1 = vpack.c.bf16 %v946_v58, %v942_v52  ;;  %v972_v46 = vld [vmem:[%s3665_s2 + $0x1f8] sm:$0xff]  ;;  %v971_v58 = vld [vmem:[%s3665_s2 + $0x1f0] sm:$0xff] }
 0x115   : > { %v2548_v12 = vpack.c.bf16 %v945_v63, %v941_v62  ;;  %v3920_v63 = vld.sshfl [vmem:[%s4167_s1 + $0x8] sm:$0x33 pattern:$0x76325410] }
 0x116   : > { %2489 = vmatpush1.bf16.msra.mxu0 %v2488_v22  ;;  %2521 = vmatpush1.bf16.msra.mxu1 %v2520_v23  ;;  %v928_v22 = vld [vmem:[%s3665_s2 + $0x98] sm:$0xff] }
 0x117   : > { %2491 = vmatprep.subr.bf16.mxu0 %v2490_v28  ;;  %2523 = vmatprep.subr.bf16.mxu1 %v2522_v29  ;;  %v932_v23 = vld [vmem:[%s3665_s2 + $0xb8] sm:$0xff]  ;;  %v2536_v29 = vpack.c.bf16 %v921_v7, %v917_v6  ;;  %v947_v6 = vld [vmem:[%s3665_s2 + $0x130] sm:$0xff]  ;;  %v954_v7 = vld [vmem:[%s3665_s2 + $0x168] sm:$0xff] }
 0x118   : > { %v2570_v35 = vpack.c.bf16 %v932_v23, %v928_v22  ;;  %v951_v23 = vld [vmem:[%s3665_s2 + $0x150] sm:$0xff] }
 0x11a   : > { %2493 = vmatpush1.bf16.msra.mxu0 %v2492_v38  ;;  %2525 = vmatpush1.bf16.msra.mxu1 %v2524_v39  ;;  %v927_v38 = vld [vmem:[%s3665_s2 + $0x90] sm:$0xff] }
 0x11b   : > { %2495 = vmatprep.subr.bf16.mxu0 %v2494_v41  ;;  %2527 = vmatprep.subr.bf16.mxu1 %v2526_v45  ;;  %v931_v39 = vld [vmem:[%s3665_s2 + $0xb0] sm:$0xff]  ;;  %v936_v41 = vld [vmem:[%s3665_s2 + $0xd8] sm:$0xff]  ;;  %v2540_v45 = vpack.c.bf16 %v929_v33, %v925_v32 }
 0x11c   : > { %v2574_v53 = vpack.c.bf16 %v940_v44, %v936_v41  ;;  %v964_v32 = vld [vmem:[%s3665_s2 + $0x1b8] sm:$0xff]  ;;  %v963_v41 = vld [vmem:[%s3665_s2 + $0x1b0] sm:$0xff]  ;;  %v970_v44 = vld [vmem:[%s3665_s2 + $0x1e8] sm:$0xff] }
 0x11e   : > { %2497 = vmatpush1.bf16.msra.mxu0 %v2496_v50  ;;  %2529 = vmatpush1.bf16.msra.mxu1 %v2528_v51  ;;  %v2572_v50 = vpack.c.bf16 %v931_v39, %v927_v38  ;;  %v2542_v51 = vpack.c.bf16 %v938_v40, %v934_v34  ;;  %v966_v38 = vld [vmem:[%s3665_s2 + $0x1c8] sm:$0xff]  ;;  %v959_v40 = vld [vmem:[%s3665_s2 + $0x190] sm:$0xff] }
 0x11f   : > { %2531 = vmatprep.subr.bf16.mxu0 %v2530_v54  ;;  %2563 = vmatprep.subr.bf16.mxu1 %v2562_v59  ;;  %v935_v54 = vld [vmem:[%s3665_s2 + $0xd0] sm:$0xff]  ;;  %v944_v59 = vld [vmem:[%s3665_s2 + $0x118] sm:$0xff]  ;;  %v2558_v52 = vpack.c.bf16 %v970_v44, %v966_v38 }
 0x120   : > { %v2576_v0 = vpack.c.bf16 %v939_v57, %v935_v54  ;;  %v2578_v3 = vpack.c.bf16 %v948_v60, %v944_v59  ;;  %v967_v57 = vld [vmem:[%s3665_s2 + $0x1d0] sm:$0xff]  ;;  %v2266_v59 = vld [vmem:[%s3665_s2 + $0x418] sm:$0xff] }
 0x121   : > { %v2270_v60 = vld [vmem:[%s3665_s2 + $0x438] sm:$0xff]  ;;  %v2592_v62 = vpack.c.bf16 %v971_v58, %v967_v57  ;;  %v2301_v38 = vld [vmem:[%s3665_s2 + $0x530] sm:$0xff] }
 0x122   : > { %v2322_v57 = vld [vmem:[%s3665_s2 + $0x5d8] sm:$0xff] }
 0x123   : > { %v2326_v58 = vld [vmem:[%s3665_s2 + $0x5f8] sm:$0xff] }
 0x1d4   : > { %v1052_v20 = vpop.f32.mrb[0].mxu1  ;;  %v3867_v26 = vpop.f32.mrb[0].mxu0 }
 0x1d5   : > { %v1054_v27 = vpop.f32.mrb[1].mxu1  ;;  %1186 = vmatmul.mubr.f32.vlgmr.msra.gmra.mrb[2].mxu0 %v1052_v20  ;;  %1257 = vmatmul.mubr.f32.vlgmr.msra.gmra.mrb[2].mxu1 %v1052_v20  ;;  %v907_v28 = vpop.f32.mrb[1].mxu0  ;;  %v2550_v20 = vpack.c.bf16 %v954_v7, %v950_v2  ;;  %v2269_v2 = vld [vmem:[%s3665_s2 + $0x430] sm:$0xff] }
 0x1d6   : > { %2533 = vmatpush1.bf16.msra.mxu0 %v2532_v5  ;;  %2565 = vmatpush1.bf16.msra.mxu1 %v2564_v10  ;;  %v943_v5 = vld [vmem:[%s3665_s2 + $0x110] sm:$0xff]  ;;  %v952_v10 = vld [vmem:[%s3665_s2 + $0x158] sm:$0xff]  ;;  %v962_v28 = vld [vmem:[%s3665_s2 + $0x1a8] sm:$0xff] }
 0x1d7   : > { %2535 = vmatprep.subr.bf16.mxu0 %v2534_v11  ;;  %2567 = vmatprep.subr.bf16.mxu1 %v2566_v13  ;;  %v956_v11 = vld [vmem:[%s3665_s2 + $0x178] sm:$0xff]  ;;  %v949_v13 = vld [vmem:[%s3665_s2 + $0x140] sm:$0xff]  ;;  %v2580_v19 = vpack.c.bf16 %v947_v6, %v943_v5  ;;  %v955_v27 = vld [vmem:[%s3665_s2 + $0x170] sm:$0xff]  ;;  %v1415_v6 = vcombine.high %v3920_v63, %v3920_v63 }
 0x1d8   : > { %1327 = vmatprep.mubr.f32.mxu0 %v3001_v55  ;;  %1398 = vmatprep.mubr.f32.mxu1 %v3001_v55  ;;  %v2582_v22 = vpack.c.bf16 %v956_v11, %v952_v10  ;;  %v2552_v33 = vpack.c.bf16 %v953_v17, %v949_v13  ;;  %v2584_v34 = vpack.c.bf16 %v955_v27, %v951_v23  ;;  %v2278_v5 = vld [vmem:[%s3665_s2 + $0x478] sm:$0xff]  ;;  %v2273_v11 = vld [vmem:[%s3665_s2 + $0x450] sm:$0xff] }
 0x1d9   : > { %v2282_v13 = vld [vmem:[%s3665_s2 + $0x498] sm:$0xff] }
 0x1da   : > { %2537 = vmatpush1.bf16.msra.mxu0 %v2536_v29  ;;  %2569 = vmatpush1.bf16.msra.mxu1 %v2568_v16  ;;  %v960_v29 = vld [vmem:[%s3665_s2 + $0x198] sm:$0xff]  ;;  %v957_v16 = vld [vmem:[%s3665_s2 + $0x180] sm:$0xff] }
 0x1db   : > { %2539 = vmatprep.subr.bf16.mxu0 %v2538_v18  ;;  %2571 = vmatprep.subr.bf16.mxu1 %v2570_v35  ;;  %v961_v18 = vld [vmem:[%s3665_s2 + $0x1a0] sm:$0xff]  ;;  %v2554_v35 = vpack.c.bf16 %v962_v28, %v958_v21  ;;  %v2586_v39 = vpack.c.bf16 %v964_v32, %v960_v29  ;;  %v2286_v17 = vld [vmem:[%s3665_s2 + $0x4b8] sm:$0xff]  ;;  %v2281_v21 = vld [vmem:[%s3665_s2 + $0x490] sm:$0xff] }
 0x1dc   : > { %v2556_v47 = vpack.c.bf16 %v961_v18, %v957_v16  ;;  %v2290_v23 = vld [vmem:[%s3665_s2 + $0x4d8] sm:$0xff]  ;;  %v2289_v29 = vld [vmem:[%s3665_s2 + $0x4d0] sm:$0xff] }
 0x1dd   : > { %v2294_v27 = vld [vmem:[%s3665_s2 + $0x4f8] sm:$0xff]  ;;  %v2293_v32 = vld [vmem:[%s3665_s2 + $0x4f0] sm:$0xff] }
 0x1de   : > { %2541 = vmatpush1.bf16.msra.mxu0 %v2540_v45  ;;  %2573 = vmatpush1.bf16.msra.mxu1 %v2572_v50  ;;  %v968_v45 = vld [vmem:[%s3665_s2 + $0x1d8] sm:$0xff]  ;;  %v965_v50 = vld [vmem:[%s3665_s2 + $0x1c0] sm:$0xff]  ;;  %v2670_v28 = vpack.c.bf16 %v2294_v27, %v2290_v23  ;;  %v2672_v18 = vpack.c.bf16 %v2293_v32, %v2289_v29  ;;  %v2288_v27 = vld [vmem:[%s3665_s2 + $0x4c8] sm:$0xff] }
 0x1df   : > { %2543 = vmatprep.subr.bf16.mxu0 %v2542_v51  ;;  %2575 = vmatprep.subr.bf16.mxu1 %v2574_v53  ;;  %v2588_v51 = vpack.c.bf16 %v963_v41, %v959_v40  ;;  %v969_v53 = vld [vmem:[%s3665_s2 + $0x1e0] sm:$0xff]  ;;  %v2590_v54 = vpack.c.bf16 %v972_v46, %v968_v45  ;;  %v2302_v16 = vld [vmem:[%s3665_s2 + $0x538] sm:$0xff]  ;;  %v2305_v45 = vld [vmem:[%s3665_s2 + $0x550] sm:$0xff] }
 0x1e0   : > { %v2310_v40 = vld [vmem:[%s3665_s2 + $0x578] sm:$0xff]  ;;  %v2309_v46 = vld [vmem:[%s3665_s2 + $0x570] sm:$0xff]  ;;  %v2283_v23 = vld [vmem:[%s3665_s2 + $0x4a0] sm:$0xff] }
 0x1e1   : > { %v2287_v29 = vld [vmem:[%s3665_s2 + $0x4c0] sm:$0xff] }
 0x1e2   : > { %2545 = vmatpush1.bf16.msra.mxu0 %v2544_v61  ;;  %2577 = vmatpush1.bf16.msra.mxu1 %v2576_v0  ;;  %v2560_v61 = vpack.c.bf16 %v969_v53, %v965_v50  ;;  %v2658_v0 = vpack.c.bf16 %v2270_v60, %v2266_v59  ;;  %v2318_v50 = vld [vmem:[%s3665_s2 + $0x5b8] sm:$0xff]  ;;  %v2313_v53 = vld [vmem:[%s3665_s2 + $0x590] sm:$0xff]  ;;  %v2686_v60 = vpack.c.bf16 %v2326_v58, %v2322_v57  ;;  %v2291_v32 = vld [vmem:[%s3665_s2 + $0x4e0] sm:$0xff] }
 0x1e3   : > { %2547 = vmatprep.subr.bf16.mxu0 %v2546_v1  ;;  %2579 = vmatprep.subr.bf16.mxu1 %v2578_v3  ;;  %v2265_v1 = vld [vmem:[%s3665_s2 + $0x410] sm:$0xff]  ;;  %v2274_v3 = vld [vmem:[%s3665_s2 + $0x458] sm:$0xff]  ;;  %v2320_v57 = vld [vmem:[%s3665_s2 + $0x5c8] sm:$0xff] }
 0x1e4   : > { %v2660_v7 = vpack.c.bf16 %v2269_v2, %v2265_v1  ;;  %v2662_v10 = vpack.c.bf16 %v2278_v5, %v2274_v3  ;;  %v2268_v1 = vld [vmem:[%s3665_s2 + $0x428] sm:$0xff]  ;;  %v2263_v3 = vld [vmem:[%s3665_s2 + $0x400] sm:$0xff] }
 0x1e5   : > { %v2267_v5 = vld [vmem:[%s3665_s2 + $0x420] sm:$0xff]  ;;  %v2324_v58 = vld [vmem:[%s3665_s2 + $0x5e8] sm:$0xff] }
 0x1e6   : > { %2549 = vmatpush1.bf16.msra.mxu0 %v2548_v12  ;;  %2581 = vmatpush1.bf16.msra.mxu1 %v2580_v19  ;;  %v2277_v12 = vld [vmem:[%s3665_s2 + $0x470] sm:$0xff] }
 0x1e7   : > { %2551 = vmatprep.subr.bf16.mxu0 %v2550_v20  ;;  %2583 = vmatprep.subr.bf16.mxu1 %v2582_v22  ;;  %v2664_v19 = vpack.c.bf16 %v2277_v12, %v2273_v11  ;;  %v2666_v20 = vpack.c.bf16 %v2286_v17, %v2282_v13  ;;  %v2285_v22 = vld [vmem:[%s3665_s2 + $0x4b0] sm:$0xff]  ;;  %v2271_v12 = vld [vmem:[%s3665_s2 + $0x440] sm:$0xff]  ;;  %v2280_v17 = vld [vmem:[%s3665_s2 + $0x488] sm:$0xff] }
 0x1e8   : > { %v2275_v13 = vld [vmem:[%s3665_s2 + $0x460] sm:$0xff] }
 0x1ea   : > { %2553 = vmatpush1.bf16.msra.mxu0 %v2552_v33  ;;  %2585 = vmatpush1.bf16.msra.mxu1 %v2584_v34  ;;  %v2298_v33 = vld [vmem:[%s3665_s2 + $0x518] sm:$0xff] }
 0x1eb   : > { %2555 = vmatprep.subr.bf16.mxu0 %v2554_v35  ;;  %2587 = vmatprep.subr.bf16.mxu1 %v2586_v39  ;;  %v2674_v34 = vpack.c.bf16 %v2302_v16, %v2298_v33  ;;  %v2297_v35 = vld [vmem:[%s3665_s2 + $0x510] sm:$0xff]  ;;  %v2306_v39 = vld [vmem:[%s3665_s2 + $0x558] sm:$0xff]  ;;  %v2296_v33 = vld [vmem:[%s3665_s2 + $0x508] sm:$0xff] }
 0x1ec   : > { %v2676_v41 = vpack.c.bf16 %v2301_v38, %v2297_v35  ;;  %v2678_v44 = vpack.c.bf16 %v2310_v40, %v2306_v39  ;;  %v2300_v16 = vld [vmem:[%s3665_s2 + $0x528] sm:$0xff]  ;;  %v2295_v35 = vld [vmem:[%s3665_s2 + $0x500] sm:$0xff] }
 0x1ed   : > { %v2299_v38 = vld [vmem:[%s3665_s2 + $0x520] sm:$0xff]  ;;  %v2304_v39 = vld [vmem:[%s3665_s2 + $0x548] sm:$0xff] }
 0x1ee   : > { %2557 = vmatpush1.bf16.msra.mxu0 %v2556_v47  ;;  %2589 = vmatpush1.bf16.msra.mxu1 %v2588_v51  ;;  %v2314_v47 = vld [vmem:[%s3665_s2 + $0x598] sm:$0xff]  ;;  %v2680_v51 = vpack.c.bf16 %v2309_v46, %v2305_v45  ;;  %v2308_v40 = vld [vmem:[%s3665_s2 + $0x568] sm:$0xff]  ;;  %v2303_v45 = vld [vmem:[%s3665_s2 + $0x540] sm:$0xff] }
 0x1ef   : > { %2559 = vmatprep.subr.bf16.mxu0 %v2558_v52  ;;  %2591 = vmatprep.subr.bf16.mxu1 %v2590_v54  ;;  %v2682_v52 = vpack.c.bf16 %v2318_v50, %v2314_v47  ;;  %v2317_v54 = vld [vmem:[%s3665_s2 + $0x5b0] sm:$0xff]  ;;  %v2307_v46 = vld [vmem:[%s3665_s2 + $0x560] sm:$0xff]  ;;  %v2312_v47 = vld [vmem:[%s3665_s2 + $0x588] sm:$0xff] }
 0x1f0   : > { %v2684_v59 = vpack.c.bf16 %v2317_v54, %v2313_v53  ;;  %v2316_v50 = vld [vmem:[%s3665_s2 + $0x5a8] sm:$0xff]  ;;  %v2311_v53 = vld [vmem:[%s3665_s2 + $0x580] sm:$0xff] }
 0x1f1   : > { %v2315_v54 = vld [vmem:[%s3665_s2 + $0x5a0] sm:$0xff] }
 0x1f2   : > { %2561 = vmatpush1.bf16.msra.mxu0 %v2560_v61  ;;  %2593 = vmatpush1.bf16.msra.mxu1 %v2592_v62  ;;  %v2321_v61 = vld [vmem:[%s3665_s2 + $0x5d0] sm:$0xff] }
 0x1f3   : > { %2595 = vmatprep.subr.bf16.mxu0 %v3672_v4  ;;  %2659 = vmatprep.subr.bf16.mxu1 %v2658_v0  ;;  %v2325_v62 = vld [vmem:[%s3665_s2 + $0x5f0] sm:$0xff] }
 0x1f4   : > { %v2688_v0 = vpack.c.bf16 %v2325_v62, %v2321_v61  ;;  %v2319_v61 = vld [vmem:[%s3665_s2 + $0x5c0] sm:$0xff] }
 0x1f5   : > { %1328 = vmatmul.mubr.f32.vlgmr.msra.gmra.mrb[2].mxu0 %v3867_v26  ;;  %1399 = vmatmul.mubr.f32.vlgmr.msra.gmra.mrb[2].mxu1 %v3867_v26  ;;  %v2668_v26 = vpack.c.bf16 %v2285_v22, %v2281_v21  ;;  %v2279_v22 = vld [vmem:[%s3665_s2 + $0x480] sm:$0xff] }
 0x1f6   : > { %1482 = vmatprep.mubr.f32.mxu0 %v1415_v6  ;;  %2661 = vmatpush1.bf16.msra.mxu1 %v2660_v7  ;;  %v2272_v6 = vld [vmem:[%s3665_s2 + $0x448] sm:$0xff]  ;;  %v2323_v62 = vld [vmem:[%s3665_s2 + $0x5e0] sm:$0xff] }
 0x1f7   : > { %2663 = vmatprep.subr.bf16.mxu1 %v2662_v10  ;;  %1688 = vmatprep.mubr.f32.mxu1 %v3001_v55  ;;  %v2276_v7 = vld [vmem:[%s3665_s2 + $0x468] sm:$0xff]  ;;  %v2628_v10 = vpack.c.bf16 %v2267_v5, %v2263_v3  ;;  %v4013_v3 = vld.sshfl [vmem:[%s4167_s1 + $0xc] sm:$0x33 pattern:$0x76325410] }
 0x1f8   : > { %v2630_v11 = vpack.c.bf16 %v2276_v7, %v2272_v6  ;;  %v2329_v5 = vld [vmem:[%s3665_s2 + $0x600] sm:$0xff]  ;;  %v2338_v7 = vld [vmem:[%s3665_s2 + $0x648] sm:$0xff] }
 0x1f9   : > { %v2333_v6 = vld [vmem:[%s3665_s2 + $0x620] sm:$0xff] }
 0x1fa   : > { %2665 = vmatpush1.bf16.msra.mxu1 %v2664_v19  ;;  %v2284_v19 = vld [vmem:[%s3665_s2 + $0x4a8] sm:$0xff] }
 0x1fb   : > { %2597 = vmatpush1.bf16.xpose.msra.mxu0 %v3677_v8  ;;  %2667 = vmatprep.subr.bf16.mxu1 %v2666_v20  ;;  %v2632_v20 = vpack.c.bf16 %v2275_v13, %v2271_v12  ;;  %v2634_v21 = vpack.c.bf16 %v2284_v19, %v2280_v17  ;;  %v2724_v12 = vpack.c.bf16 %v2333_v6, %v2329_v5  ;;  %v2337_v19 = vld [vmem:[%s3665_s2 + $0x640] sm:$0xff]  ;;  %v2347_v6 = vld [vmem:[%s3665_s2 + $0x690] sm:$0xff] }
 0x1fc   : > { %2599 = vmatprep.subr.bf16.mxu0 %v3679_v9 }
 0x1fe   : > { %2669 = vmatpush1.bf16.msra.mxu1 %v2668_v26  ;;  %v2292_v26 = vld [vmem:[%s3665_s2 + $0x4e8] sm:$0xff] }
 0x1ff   : > { %2671 = vmatprep.subr.bf16.mxu1 %v2670_v28  ;;  %v2636_v28 = vpack.c.bf16 %v2283_v23, %v2279_v22  ;;  %v2346_v22 = vld [vmem:[%s3665_s2 + $0x688] sm:$0xff] }
 0x200   : > { %v2350_v23 = vld [vmem:[%s3665_s2 + $0x6a8] sm:$0xff] }
 0x202   : > { %2673 = vmatpush1.bf16.msra.mxu1 %v2672_v18  ;;  %v2640_v18 = vpack.c.bf16 %v2291_v32, %v2287_v29  ;;  %v2354_v29 = vld [vmem:[%s3665_s2 + $0x6c8] sm:$0xff] }
 0x203   : > { %2601 = vmatpush1.bf16.xpose.msra.mxu0 %v3691_v14  ;;  %2675 = vmatprep.subr.bf16.mxu1 %v2674_v34  ;;  %v2642_v34 = vpack.c.bf16 %v2300_v16, %v2296_v33  ;;  %v2358_v32 = vld [vmem:[%s3665_s2 + $0x6e8] sm:$0xff]  ;;  %v2353_v33 = vld [vmem:[%s3665_s2 + $0x6c0] sm:$0xff] }
 0x204   : > { %2603 = vmatprep.subr.bf16.mxu0 %v3693_v15  ;;  %v2357_v16 = vld [vmem:[%s3665_s2 + $0x6e0] sm:$0xff] }
 0x206   : > { %2677 = vmatpush1.bf16.msra.mxu1 %v2676_v41  ;;  %v2644_v41 = vpack.c.bf16 %v2299_v38, %v2295_v35  ;;  %v2736_v35 = vpack.c.bf16 %v2357_v16, %v2353_v33 }
 0x207   : > { %2679 = vmatprep.subr.bf16.mxu1 %v2678_v44  ;;  %v2646_v44 = vpack.c.bf16 %v2308_v40, %v2304_v39  ;;  %v2361_v39 = vld [vmem:[%s3665_s2 + $0x700] sm:$0xff] }
 0x208   : > { %v2365_v40 = vld [vmem:[%s3665_s2 + $0x720] sm:$0xff] }
 0x20a   : > { %2681 = vmatpush1.bf16.msra.mxu1 %v2680_v51  ;;  %v2648_v51 = vpack.c.bf16 %v2307_v46, %v2303_v45  ;;  %v2740_v45 = vpack.c.bf16 %v2365_v40, %v2361_v39  ;;  %v2369_v46 = vld [vmem:[%s3665_s2 + $0x740] sm:$0xff] }
 0x20b   : > { %2605 = vmatpush1.bf16.xpose.msra.mxu0 %v3717_v24  ;;  %2683 = vmatprep.subr.bf16.mxu1 %v2682_v52  ;;  %v2650_v52 = vpack.c.bf16 %v2316_v50, %v2312_v47  ;;  %v2373_v47 = vld [vmem:[%s3665_s2 + $0x760] sm:$0xff]  ;;  %v2382_v50 = vld [vmem:[%s3665_s2 + $0x7a8] sm:$0xff] }
 0x20c   : > { %2607 = vmatprep.subr.bf16.mxu0 %v3719_v25 }
 0x20e   : > { %2685 = vmatpush1.bf16.msra.mxu1 %v2684_v59  ;;  %v2652_v59 = vpack.c.bf16 %v2315_v54, %v2311_v53  ;;  %v2377_v53 = vld [vmem:[%s3665_s2 + $0x780] sm:$0xff] }
 0x20f   : > { %2687 = vmatprep.subr.bf16.mxu1 %v2686_v60  ;;  %v2654_v60 = vpack.c.bf16 %v2324_v58, %v2320_v57  ;;  %v2381_v54 = vld [vmem:[%s3665_s2 + $0x7a0] sm:$0xff]  ;;  %v2386_v57 = vld [vmem:[%s3665_s2 + $0x7c8] sm:$0xff] }
 0x210   : > { %v2390_v58 = vld [vmem:[%s3665_s2 + $0x7e8] sm:$0xff] }
 0x212   : > { %2689 = vmatpush1.bf16.msra.mxu1 %v2688_v0  ;;  %v2656_v0 = vpack.c.bf16 %v2323_v62, %v2319_v61  ;;  %v2385_v61 = vld [vmem:[%s3665_s2 + $0x7c0] sm:$0xff] }
 0x213   : > { %2609 = vmatpush1.bf16.xpose.msra.mxu0 %v3729_v30  ;;  %2691 = vmatprep.subr.bf16.mxu1 %v3672_v4  ;;  %v2264_v4 = vld [vmem:[%s3665_s2 + $0x408] sm:$0xff]  ;;  %v2389_v62 = vld [vmem:[%s3665_s2 + $0x7e0] sm:$0xff] }
 0x214   : > { %2611 = vmatprep.subr.bf16.mxu0 %v3731_v31  ;;  %v2626_v2 = vpack.c.bf16 %v2268_v1, %v2264_v4  ;;  %v2330_v4 = vld [vmem:[%s3665_s2 + $0x608] sm:$0xff] }
 0x215   : > { %v2334_v1 = vld [vmem:[%s3665_s2 + $0x628] sm:$0xff] }
 0x21b   : > { %2613 = vmatpush1.bf16.xpose.msra.mxu0 %v3741_v36 }
 0x21c   : > { %2615 = vmatprep.subr.bf16.mxu0 %v3743_v37 }
 0x223   : > { %2617 = vmatpush1.bf16.xpose.msra.mxu0 %v3753_v42 }
 0x224   : > { %2619 = vmatprep.subr.bf16.mxu0 %v3755_v43 }
 0x22b   : > { %2621 = vmatpush1.bf16.xpose.msra.mxu0 %v3765_v48 }
 0x22c   : > { %2623 = vmatprep.subr.bf16.mxu0 %v3767_v49 }
 0x233   : > { %2625 = vmatpush1.bf16.xpose.msra.mxu0 %v3779_v56 }
 0x234   : > { %2627 = vmatprep.subr.bf16.mxu0 %v2626_v2  ;;  %v2722_v2 = vpack.c.bf16 %v2334_v1, %v2330_v4  ;;  %v2343_v1 = vld [vmem:[%s3665_s2 + $0x670] sm:$0xff] }
 0x23a   : > { %1483 = vmatmul.mubr.f32.vlgmr.msra.gmra.mrb[4].mxu0 %v3920_v63  ;;  %v2638_v63 = vpack.c.bf16 %v2292_v26, %v2288_v27  ;;  %v2730_v26 = vpack.c.bf16 %v2350_v23, %v2346_v22  ;;  %v2363_v22 = vld [vmem:[%s3665_s2 + $0x710] sm:$0xff] }
 0x23b   : > { %2629 = vmatpush1.bf16.msra.mxu0 %v2628_v10  ;;  %1617 = vmatprep.mubr.f32.mxu0 %v3001_v55  ;;  %v2342_v10 = vld [vmem:[%s3665_s2 + $0x668] sm:$0xff]  ;;  %v2367_v23 = vld [vmem:[%s3665_s2 + $0x730] sm:$0xff] }
 0x23c   : > { %2631 = vmatprep.subr.bf16.mxu0 %v2630_v11  ;;  %v1709_v11 = vcombine.high %v4013_v3, %v4013_v3  ;;  %v2726_v17 = vpack.c.bf16 %v2342_v10, %v2338_v7  ;;  %v2351_v7 = vld [vmem:[%s3665_s2 + $0x6b0] sm:$0xff]  ;;  %v2356_v10 = vld [vmem:[%s3665_s2 + $0x6d8] sm:$0xff] }
 0x23f   : > { %2633 = vmatpush1.bf16.msra.mxu0 %v2632_v20  ;;  %v2341_v20 = vld [vmem:[%s3665_s2 + $0x660] sm:$0xff] }
 0x240   : > { %2635 = vmatprep.subr.bf16.mxu0 %v2634_v21  ;;  %v2728_v27 = vpack.c.bf16 %v2341_v20, %v2337_v19  ;;  %v2364_v19 = vld [vmem:[%s3665_s2 + $0x718] sm:$0xff] }
 0x243   : > { %2637 = vmatpush1.bf16.msra.mxu0 %v2636_v28  ;;  %v2345_v28 = vld [vmem:[%s3665_s2 + $0x680] sm:$0xff] }
 0x244   : > { %2639 = vmatprep.subr.bf16.mxu0 %v2638_v63  ;;  %v2349_v63 = vld [vmem:[%s3665_s2 + $0x6a0] sm:$0xff] }
 0x247   : > { %2641 = vmatpush1.bf16.msra.mxu0 %v2640_v18  ;;  %v2362_v18 = vld [vmem:[%s3665_s2 + $0x708] sm:$0xff] }
 0x248   : > { %2643 = vmatprep.subr.bf16.mxu0 %v2642_v34  ;;  %v2366_v34 = vld [vmem:[%s3665_s2 + $0x728] sm:$0xff] }
 0x249   : > { %v2738_v38 = vpack.c.bf16 %v2366_v34, %v2362_v18  ;;  %v2379_v18 = vld [vmem:[%s3665_s2 + $0x790] sm:$0xff] }
 0x24a   : > { %v2383_v34 = vld [vmem:[%s3665_s2 + $0x7b0] sm:$0xff] }
 0x24b   : > { %2645 = vmatpush1.bf16.msra.mxu0 %v2644_v41  ;;  %v2370_v41 = vld [vmem:[%s3665_s2 + $0x748] sm:$0xff]  ;;  %v2780_v39 = vpack.c.bf16 %v2383_v34, %v2379_v18 }
 0x24c   : > { %2647 = vmatprep.subr.bf16.mxu0 %v2646_v44  ;;  %v2374_v44 = vld [vmem:[%s3665_s2 + $0x768] sm:$0xff] }
 0x24f   : > { %2649 = vmatpush1.bf16.msra.mxu0 %v2648_v51  ;;  %v2744_v51 = vpack.c.bf16 %v2373_v47, %v2369_v46  ;;  %v3002_v47 = vmov 1983009808  }
 0x250   : > { %2651 = vmatprep.subr.bf16.mxu0 %v2650_v52 }
 0x253   : > { %2653 = vmatpush1.bf16.msra.mxu0 %v2652_v59  ;;  %v2748_v59 = vpack.c.bf16 %v2381_v54, %v2377_v53 }
 0x254   : > { %2655 = vmatprep.subr.bf16.mxu0 %v2654_v60  ;;  %v2750_v60 = vpack.c.bf16 %v2390_v58, %v2386_v57 }
 0x257   : > { %2657 = vmatpush1.bf16.msra.mxu0 %v2656_v0  ;;  %v2344_v0 = vld [vmem:[%s3665_s2 + $0x678] sm:$0xff] }
 0x258   : > { %2723 = vmatprep.subr.bf16.mxu0 %v2722_v2  ;;  %v2348_v2 = vld [vmem:[%s3665_s2 + $0x698] sm:$0xff] }
 0x30d   : > { %v1484_v13 = vpop.f32.mrb[4].mxu0 }
 0x30e   : > { %v1486_v21 = vpop.f32.mrb[5].mxu0  ;;  %1618 = vmatmul.mubr.f32.vlgmr.msra.gmra.mrb[2].mxu0 %v1484_v13  ;;  %1689 = vmatmul.mubr.f32.vlgmr.msra.gmra.mrb[2].mxu1 %v1484_v13  ;;  %v2355_v13 = vld [vmem:[%s3665_s2 + $0x6d0] sm:$0xff] }
 0x30f   : > { %2693 = vmatpush1.bf16.xpose.msra.mxu1 %v3677_v8  ;;  %1776 = vmatprep.mubr.f32.mxu1 %v1709_v11  ;;  %v2732_v8 = vpack.c.bf16 %v2349_v63, %v2345_v28  ;;  %v2360_v11 = vld [vmem:[%s3665_s2 + $0x6f8] sm:$0xff]  ;;  %v2772_v28 = vpack.c.bf16 %v2367_v23, %v2363_v22 }
 0x310   : > { %2695 = vmatprep.subr.bf16.mxu1 %v3679_v9  ;;  %2725 = vmatpush1.bf16.msra.mxu0 %v2724_v12  ;;  %v2734_v9 = vpack.c.bf16 %v2358_v32, %v2354_v29  ;;  %v2764_v12 = vpack.c.bf16 %v2351_v7, %v2347_v6  ;;  %v2371_v29 = vld [vmem:[%s3665_s2 + $0x750] sm:$0xff] }
 0x311   : > { %2727 = vmatprep.subr.bf16.mxu0 %v2726_v17  ;;  %1911 = vmatprep.mubr.f32.mxu0 %v3001_v55  ;;  %v2359_v17 = vld [vmem:[%s3665_s2 + $0x6f0] sm:$0xff] }
 0x312   : > { %v2768_v20 = vpack.c.bf16 %v2359_v17, %v2355_v13  ;;  %v2375_v32 = vld [vmem:[%s3665_s2 + $0x770] sm:$0xff] }
 0x313   : > { %v2776_v33 = vpack.c.bf16 %v2375_v32, %v2371_v29 }
 0x314   : > { %2729 = vmatpush1.bf16.msra.mxu0 %v2728_v27  ;;  %v2372_v27 = vld [vmem:[%s3665_s2 + $0x758] sm:$0xff] }
 0x315   : > { %2731 = vmatprep.subr.bf16.mxu0 %v2730_v26  ;;  %v2376_v26 = vld [vmem:[%s3665_s2 + $0x778] sm:$0xff] }
 0x316   : > { %v2774_v63 = vpack.c.bf16 %v2376_v26, %v2372_v27 }
 0x317   : > { %2697 = vmatpush1.bf16.xpose.msra.mxu1 %v3691_v14  ;;  %v2742_v14 = vpack.c.bf16 %v2374_v44, %v2370_v41  ;;  %v2387_v41 = vld [vmem:[%s3665_s2 + $0x7d0] sm:$0xff] }
 0x318   : > { %2699 = vmatprep.subr.bf16.mxu1 %v3693_v15  ;;  %2733 = vmatpush1.bf16.msra.mxu0 %v2732_v8  ;;  %v2378_v15 = vld [vmem:[%s3665_s2 + $0x788] sm:$0xff]  ;;  %v2380_v8 = vld [vmem:[%s3665_s2 + $0x798] sm:$0xff]  ;;  %v2391_v44 = vld [vmem:[%s3665_s2 + $0x7f0] sm:$0xff] }
 0x319   : > { %2735 = vmatprep.subr.bf16.mxu0 %v2734_v9  ;;  %v2746_v52 = vpack.c.bf16 %v2382_v50, %v2378_v15  ;;  %v2384_v9 = vld [vmem:[%s3665_s2 + $0x7b8] sm:$0xff]  ;;  %v2001_v15 = vunpack.c.l.s4 %v3002_v47  ;;  %v2003_v50 = vlaneseq }
 0x31a   : > { %v2778_v16 = vpack.c.bf16 %v2384_v9, %v2380_v8 }
 0x31c   : > { %2737 = vmatpush1.bf16.msra.mxu0 %v2736_v35  ;;  %v2388_v35 = vld [vmem:[%s3665_s2 + $0x7d8] sm:$0xff] }
 0x31d   : > { %2739 = vmatprep.subr.bf16.mxu0 %v2738_v38  ;;  %v2392_v38 = vld [vmem:[%s3665_s2 + $0x7f8] sm:$0xff] }
 0x31e   : > { %v2782_v40 = vpack.c.bf16 %v2392_v38, %v2388_v35 }
 0x31f   : > { %2701 = vmatpush1.bf16.xpose.msra.mxu1 %v3717_v24  ;;  %v2752_v24 = vpack.c.bf16 %v2389_v62, %v2385_v61 }
 0x320   : > { %2703 = vmatprep.subr.bf16.mxu1 %v3719_v25  ;;  %2741 = vmatpush1.bf16.msra.mxu0 %v2740_v45  ;;  %v2332_v25 = vld [vmem:[%s3665_s2 + $0x618] sm:$0xff]  ;;  %v2784_v45 = vpack.c.bf16 %v2391_v44, %v2387_v41 }
 0x321   : > { %2743 = vmatprep.subr.bf16.mxu0 %v2742_v14 }
 0x324   : > { %2745 = vmatpush1.bf16.msra.mxu0 %v2744_v51  ;;  %v2002_v51 = vunpack.c.0.s8 %v2001_v15 }
 0x325   : > { %2747 = vmatprep.subr.bf16.mxu0 %v2746_v52  ;;  %v2004_v52 = vshrl.u32 %v2003_v50, 7 }
 0x327   : > { %2705 = vmatpush1.bf16.xpose.msra.mxu1 %v3729_v30  ;;  %v2336_v30 = vld [vmem:[%s3665_s2 + $0x638] sm:$0xff]  ;;  %v2005_v57 = vsub.s32 %v2002_v51, %v2004_v52 }
 0x328   : > { %2707 = vmatprep.subr.bf16.mxu1 %v3731_v31  ;;  %2749 = vmatpush1.bf16.msra.mxu0 %v2748_v59  ;;  %v2754_v31 = vpack.c.bf16 %v2336_v30, %v2332_v25  ;;  %v1993_v25 = vld [vmem:[#allocation2] sm:$0xff] }
 0x329   : > { %2751 = vmatprep.subr.bf16.mxu0 %v2750_v60 }
 0x32c   : > { %2753 = vmatpush1.bf16.msra.mxu0 %v2752_v24 }
 0x32f   : > { %2709 = vmatpush1.bf16.xpose.msra.mxu1 %v3741_v36  ;;  %v2331_v36 = vld [vmem:[%s3665_s2 + $0x610] sm:$0xff] }
 0x330   : > { %2711 = vmatprep.subr.bf16.mxu1 %v3743_v37  ;;  %v2335_v37 = vld [vmem:[%s3665_s2 + $0x630] sm:$0xff] }
 0x337   : > { %2713 = vmatpush1.bf16.xpose.msra.mxu1 %v3753_v42  ;;  %v2340_v42 = vld [vmem:[%s3665_s2 + $0x658] sm:$0xff] }
 0x338   : > { %2715 = vmatprep.subr.bf16.mxu1 %v3755_v43  ;;  %v2756_v43 = vpack.c.bf16 %v2335_v37, %v2331_v36  ;;  %v2758_v4 = vpack.c.bf16 %v2344_v0, %v2340_v42  ;;  %v2023_v36 = vld [vmem:[%s787_s14] sm:$0xf] (!%p2393_p6)  ;;  %v2027_v37 = vsub.s32 (!%p2393_p6), 0, %v2004_v52  ;;  %v2031_v42 = vsub.s32 (!%p2393_p6), 1, %v2004_v52 }
 0x339   : > { %v2035_v0 = vsub.s32 (!%p2393_p6), 2, %v2004_v52 }
 0x33f   : > { %2717 = vmatpush1.bf16.xpose.msra.mxu1 %v3765_v48  ;;  %v2339_v48 = vld [vmem:[%s3665_s2 + $0x650] sm:$0xff] }
 0x340   : > { %2719 = vmatprep.subr.bf16.mxu1 %v3767_v49  ;;  %v2352_v49 = vld [vmem:[%s3665_s2 + $0x6b8] sm:$0xff] }
 0x341   : > { %v2762_v5 = vpack.c.bf16 %v2352_v49, %v2348_v2 }
 0x347   : > { %2721 = vmatpush1.bf16.xpose.msra.mxu1 %v3779_v56  ;;  %v2760_v56 = vpack.c.bf16 %v2343_v1, %v2339_v48  ;;  %v2032_v48 = vrot.slane (!%p2393_p6), %v2023_v36, %v2031_v42  ;;  %v2036_v1 = vrot.slane (!%p2393_p6), %v2023_v36, %v2035_v0 }
 0x348   : > { %2755 = vmatprep.subr.bf16.mxu1 %v2754_v31 }
 0x34e   : > { %1777 = vmatmul.mubr.f32.vlgmr.msra.gmra.mrb[4].mxu1 %v4013_v3  ;;  %v2766_v3 = vpack.c.bf16 %v2360_v11, %v2356_v10 }
 0x34f   : > { %2757 = vmatpush1.bf16.msra.mxu1 %v2756_v43  ;;  %1982 = vmatprep.mubr.f32.mxu1 %v3001_v55  ;;  %v2368_v55 = vld [vmem:[%s3665_s2 + $0x738] sm:$0xff]  ;;  %v2039_v43 = vsub.s32 (!%p2393_p6), 3, %v2004_v52 }
 0x350   : > { %2759 = vmatprep.subr.bf16.mxu1 %v2758_v4  ;;  %v2770_v21 = vpack.c.bf16 %v2368_v55, %v2364_v19  ;;  %v2028_v4 = vrot.slane (!%p2393_p6), %v2023_v36, %v2027_v37 }
 0x351   : > { %v2040_v2 = vrot.slane (!%p2393_p6), %v2023_v36, %v2039_v43 }
 0x352   : > { %v2041_v49 = vcombine.low (!%p2393_p6), %v2028_v4, %v2032_v48 }
 0x353   : > { %2761 = vmatpush1.bf16.msra.mxu1 %v2760_v56  ;;  %v2042_v56 = vcombine.low (!%p2393_p6), %v2036_v1, %v2040_v2 }
 0x354   : > { %2763 = vmatprep.subr.bf16.mxu1 %v2762_v5  ;;  %v2049_v5 = vrot.slane (!%p2393_p6), %v2041_v49, %v2005_v57 }
 0x355   : > { %v2056_v6 = vrot.slane (!%p2393_p6), %v2042_v56, %v2005_v57 }
 0x357   : > { %2765 = vmatpush1.bf16.msra.mxu1 %v2764_v12  ;;  %v2057_v10 = vcombine.low (!%p2393_p6), %v2049_v5, %v2056_v6 }
 0x358   : > { %2767 = vmatprep.subr.bf16.mxu1 %v2766_v3 }
 0x35b   : > { %2769 = vmatpush1.bf16.msra.mxu1 %v2768_v20 }
 0x35c   : > { %2771 = vmatprep.subr.bf16.mxu1 %v2770_v21 }
 0x35f   : > { %2773 = vmatpush1.bf16.msra.mxu1 %v2772_v28 }
 0x360   : > { %2775 = vmatprep.subr.bf16.mxu1 %v2774_v63 }
 0x363   : > { %2777 = vmatpush1.bf16.msra.mxu1 %v2776_v33 }
 0x364   : > { %2779 = vmatprep.subr.bf16.mxu1 %v2778_v16 }
 0x367   : > { %2781 = vmatpush1.bf16.msra.mxu1 %v2780_v39 }
 0x368   : > { %2783 = vmatprep.subr.bf16.mxu1 %v2782_v40 }
 0x36b   : > { %2785 = vmatpush1.bf16.msra.mxu1 %v2784_v45 }
 0x421   : > { %v1778_v14 = vpop.f32.mrb[4].mxu1 }
 0x422   : > { %v1780_v46 = vpop.f32.mrb[5].mxu1  ;;  %1912 = vmatmul.mubr.f32.vlgmr.msra.gmra.mrb[2].mxu0 %v1778_v14  ;;  %1983 = vmatmul.mubr.f32.vlgmr.msra.gmra.mrb[2].mxu1 %v1778_v14 }
 0x4f5   : > { %v1913_v53 = vpop.f32.mrb[2].mxu0  ;;  %v1984_v54 = vpop.f32.mrb[2].mxu1 }
 0x4f6   : > { %v1915_v58 = vpop.f32.mrb[3].mxu0  ;;  %v1986_v59 = vpop.f32.mrb[3].mxu1 }
 0x4f7   : > { %v1998_v60 = vcombine.low %v1913_v53, %v1915_v58  ;;  %v1999_v61 = vcombine.low %v1984_v54, %v1986_v59 }
 0x4f9   : > { %v2006_v62 = vrot.slane %v1998_v60, %v2005_v57  ;;  %v2013_v24 = vrot.slane %v1999_v61, %v2005_v57  ;;  %2021 = sbr.rel (%p2393_p6) target bundleno = 1292 (0x50c), region = 67 }
 0x4fb   : > { %v2014_v30 = vcombine.low %v2006_v62, %v2013_v24 }
 0x4fd   : > { %v2016_v31 = vadd.f32 %v2014_v30, %v1993_v25 }
 0x4ff   : > { %2017 = vst [vmem:[#allocation2] sm:$0xff] %v2016_v31 }
 0x506   : > { %v2022_v7 = vld [vmem:[#allocation2] sm:$0xff] }
 0x507   : > { %v2059_v11 = vadd.f32 %v2057_v10, %v2022_v7 }
 0x509   : > { %v2060_v12 = vmax.f32 %v2059_v11, 0.0 }
 0x50b   : > { %2061 = vst [vmem:[%s774_s28] sm:$0xff] %v2060_v12 }
 0x50c PF: > { %s2401_s20 = sshll.u32 %s2986_s21, 7  ;;  %s2077_s9 = sshll.u32 %s774_s28, 4  ;;  %s2078_s9 = int_to_ptr.vmem [resolvable:$true] %s2077_s9 }
 0x50d   : > { %s4109_s30 = scalar_lea.hbm %s4170_s4, %s2401_s20  ;;  %s4179_s6 = sand.u32 1, %s2966_s16  }
 0x50e   : > { %s2063_s29 = scalar_lea.sflag [#allocation5], %s4179_s6  ;;  %s2888_s5 = scalar_lea.vmem %s2078_s9, 128 }
 0x50f   : > { %p2889_p8 = scmp.ne.s32.totalorder %s2078_s9, %s2888_s5  ;;  %s3003_s18 = smov [#allocation4]  }
 0x510   : > { %s2892_s13 = sshll.u32 %s3003_s18, 4  ;;  %s2893_s13 = int_to_ptr.vmem [resolvable:$false] %s2892_s13 }
 0x511   : > { %p2890_p9 = pnand %p2889_p8, %p3101_p7  ;;  %s2894_s2 = scalar_lea.vmem %s2893_s13, 256 }
 0x512   : > { %p2895_p11 = scmp.lt.s32.totalorder %s2078_s9, %s2893_s13  ;;  %p2896_p13 = scmp.lt.s32.totalorder %s2894_s2, %s2888_s5 }
 0x513   : > { %p2891_p10 = pneg %p2890_p9 }
 0x514   : > { %p2897_p0 = por %p2896_p13, %p2895_p11 }
 0x516   : > { %p2898_p1 = pnand %p2897_p0, %p2891_p10 }
 0x518   : > { %2901 = shalt.err (!%p2898_p1)
}
 0x519   : > { %s2902_s21 = scalar_lea.hbm %s4109_s30, 128  ;;  %s2906_s25 = scalar_lea.hbm %s4170_s4, 256 }
 0x51a   : > { %p2903_p2 = scmp.ne.s32.totalorder %s4109_s30, %s2902_s21  ;;  %p2907_p5 = scmp.lt.u32.totalorder %s4109_s30, %s4170_s4 }
 0x51b   : > { %p2908_p6 = scmp.lt.u32.totalorder %s2906_s25, %s2902_s21  ;;  %p2910_p9 = scmp.lt.u32.totalorder %s2902_s21, %s4109_s30 }
 0x51c   : > { %p2904_p3 = pnand %p2903_p2, %p3101_p7 }
 0x51d   : > { %p2909_p8 = por %p2908_p6, %p2907_p5 }
 0x51e   : > { %p2905_p4 = pneg %p2904_p3 }
 0x51f   : > { %p2911_p10 = por %p2910_p9, %p2909_p8 }
 0x521   : > { %p2912_p11 = pnand %p2911_p10, %p2905_p4 }
 0x523   : > { %2915 = shalt.err (!%p2912_p11)
}
 0x524   : > { %2798 = dma.vmem_to_hbm [thread:$0]  (%p3101_p7), %s2078_s9, 128, %s4109_s30, %s2063_s29  }
 0x525 PF: > { %p2804_p13 = scmp.ge.s32.totalorder %s2998_s24, 2  ;;  %s2089_s8 = sand.u32 1, %s2962_s15  }
 0x526   : > { %s2090_s6 = scalar_lea.sflag [#allocation5], %s2089_s8 }
 0x527   : > { %p2801_p0 = pnand %p2804_p13, %p3109_p12 }
 0x529   : > { %2957 = dma.done.wait (!%p2801_p0), %s2090_s6, 128  }
 0x52a   : > { %2959 = vsyncadd (!%p2801_p0), %s2090_s6, 4294967168  ;;  %s17_s24 = sadd.s32 1, %s2998_s24   ;;  %s4180_s7 = sld [smem:[#allocation7_spill]] }
 0x52b   : > { %p14_p1 = scmp.ge.s32.totalorder %s17_s24, 6   ;;  %s4181_s15 = smov %s2966_s16 }
 0x52c   : > { %s4182_s16 = smov %s2970_s17  ;;  %s4183_s17 = smov %s3114_s11 }
 0x52d   : > { %s4184_s18 = smov %s2978_s19  ;;  %s4185_s19 = smov %s3117_s12 }
 0x52e   : > { %s4186_s20 = smov %s2990_s22  ;;  %s4187_s21 = smov %s2994_s23 }
 0x52f   : > { %s4188_s22 = smov %s4191_s27  ;;  %16 = sbr.rel (!%p14_p1) target bundleno = 8 (0x8), region = 119 }
 0x530   : > { %s4189_s23 = smov %s4180_s7 }
 0x536   :  { %2095 = vsyncpa [#allocation5], 1 }
 0x537   :  { %2097 = vsyncpa [#allocation5 + $0x1], 1 }

</bundles_post_ra>
